<compile_context>
chip_gen: v7x
topology: tpu7x:2x2x1
jax: 0.10.0
libtpu: 0.0.40
codegen_flags: <defaults>
</compile_context>

<pallas_src>
import functools

import numpy as np
import jax
import jax.numpy as jnp
from jax import lax
from jax.experimental import pallas as pl
from jax.experimental.pallas import tpu as pltpu


# ----------------------------- Pallas kernel ------------------------------- #
def _phase_loss_kernel(ft_ref, fp_ref, basis_ref, out_ref, acc_ref):
    # ft_ref / fp_ref : (block_rows, n_fft)  bf16 target / prediction frames
    # basis_ref       : (n_fft, 2*n_freq_pad) bf16  [win*cos | -win*sin]
    # out_ref         : (1, 1, 1) f32  per-outer-slice partial sum
    # acc_ref         : (block_rows, n_freq_pad) f32 VMEM accumulator (resident)
    i = pl.program_id(1)

    @pl.when(i == 0)
    def _():
        acc_ref[...] = jnp.zeros_like(acc_ref)

    basis = basis_ref[...]
    nfp = basis.shape[1] // 2

    # Two MXU matmuls against the resident basis; f32 accumulation.
    Xt = jnp.dot(ft_ref[...], basis, preferred_element_type=jnp.float32)
    Xp = jnp.dot(fp_ref[...], basis, preferred_element_type=jnp.float32)

    # Tile-aligned slices (nfp is a multiple of 128 lanes).
    re_t = Xt[:, :nfp]
    im_t = Xt[:, nfp:]
    re_p = Xp[:, :nfp]
    im_p = Xp[:, nfp:]

    m2_t = re_t * re_t + im_t * im_t
    m2_p = re_p * re_p + im_p * im_p
    gt = m2_t > 0.0
    gp = m2_p > 0.0

    # Per-operand guards reproduce torch.angle(0)=0:
    #   |X_t|=0 -> phi_t=0 -> cos(dphi)=cos(phi_p); |X_p|=0 symmetric;
    #   both zero -> cos(dphi)=1 -> err=0 (also covers padded rows/lanes).
    num = jnp.where(gp, re_p, 1.0) * jnp.where(gt, re_t, 1.0) + im_p * im_t
    den = jnp.where(gt, m2_t, 1.0) * jnp.where(gp, m2_p, 1.0)
    acc_ref[...] += 1.0 - num * lax.rsqrt(den)

    @pl.when(i == pl.num_programs(1) - 1)
    def _():
        out_ref[...] = jnp.broadcast_to(jnp.sum(acc_ref[...]), (1, 1, 1))


# ------------------------------ JAX glue ------------------------------------ #
def _frame(x, n_fft, hop):
    """(B, T) -> (B * n_frames, n_fft) with torch.stft(center=True) framing."""
    B, T = x.shape
    pad = n_fft // 2
    x_pad = jnp.pad(x, ((0, 0), (pad, pad)), mode="reflect")
    n_frames = 1 + (T + 2 * pad - n_fft) // hop
    idx = jnp.arange(n_frames)[:, None] * hop + jnp.arange(n_fft)[None, :]
    frames = x_pad[:, idx]                       # (B, n_frames, n_fft)
    return frames.reshape(B * n_frames, n_fft), n_frames
    # TODO(synk): for v5e (HBM-bound) frame in-kernel from contiguous waveform
    # chunks (hop | n_fft) to avoid the ~4x framing blowup in HBM.


@functools.lru_cache(maxsize=None)
def _fused_dft_basis(n_fft, n_freq_pad):
    """bf16 (n_fft, 2*n_freq_pad): [win*cos | -win*sin], freq axis zero-padded.

    Built once per (n_fft, n_freq_pad) in numpy; never recomputed per call.
    """
    n_freq = n_fft // 2 + 1
    n = np.arange(n_fft, dtype=np.float64)
    k = np.arange(n_freq, dtype=np.float64)
    # periodic Hann window (torch.hann_window default)
    win = 0.5 * (1.0 - np.cos(2.0 * np.pi * n / n_fft))
    ang = 2.0 * np.pi * n[:, None] * k[None, :] / n_fft
    cosb = win[:, None] * np.cos(ang)
    sinb = -win[:, None] * np.sin(ang)
    pad = n_freq_pad - n_freq
    cosb = np.pad(cosb, ((0, 0), (0, pad)))
    sinb = np.pad(sinb, ((0, 0), (0, pad)))
    basis = np.concatenate([cosb, sinb], axis=1)
    return jnp.asarray(basis, dtype=jnp.bfloat16)


def _default_num_parallel():
    """2 on v7x (two TensorCores per chip), 1 on single-TC parts (v5e/v6e)."""
    try:
        kind = jax.devices()[0].device_kind.lower()
    except Exception:
        return 1
    return 2 if ("v7" in kind or "7x" in kind) else 1


@functools.partial(
    jax.jit,
    static_argnames=("n_fft", "hop_length", "block_rows", "num_parallel"))
def _phase_only_loss_impl(target, pred, basis, *, n_fft, hop_length,
                          block_rows, num_parallel):
    # TODO(synk): voiced_weighting / voiced_mask path not implemented
    # (module default is voiced_weighting=False).
    B, T = target.shape
    n_freq = n_fft // 2 + 1
    n_freq_pad = ((n_freq + 127) // 128) * 128

    frames_t, n_frames = _frame(target.astype(jnp.float32), n_fft, hop_length)
    frames_p, _ = _frame(pred.astype(jnp.float32), n_fft, hop_length)
    # bf16 matmul operands (f32 accumulate inside the kernel).
    frames_t = frames_t.astype(jnp.bfloat16)
    frames_p = frames_p.astype(jnp.bfloat16)

    rows = B * n_frames
    P = num_parallel
    nb = pl.cdiv(rows, block_rows)
    nb = pl.cdiv(nb, P) * P                      # divisible by P
    rows_pad = nb * block_rows
    if rows_pad != rows:
        pad_amt = rows_pad - rows
        frames_t = jnp.pad(frames_t, ((0, pad_amt), (0, 0)))
        frames_p = jnp.pad(frames_p, ((0, pad_amt), (0, 0)))

    nb_per_slice = nb // P
    grid = (P, nb_per_slice)

    # VMEM budget derived from actual buffer need (+ headroom for temps).
    vmem_need = (2 * 2 * block_rows * n_fft * 2          # frame tiles, x2 bufs
                 + 2 * n_fft * (2 * n_freq_pad) * 2      # basis, x2 bufs
                 + block_rows * n_freq_pad * 4)          # f32 accumulator
    vmem_limit = min(2 * vmem_need + (16 << 20), 56 << 20)

    partials = pl.pallas_call(
        _phase_loss_kernel,
        out_shape=jax.ShapeDtypeStruct((P, 1, 1), jnp.float32),
        grid_spec=pltpu.PrefetchScalarGridSpec(
            num_scalar_prefetch=0,
            grid=grid,
            in_specs=[
                pl.BlockSpec((block_rows, n_fft),
                             lambda c, i: (c * nb_per_slice + i, 0)),
                pl.BlockSpec((block_rows, n_fft),
                             lambda c, i: (c * nb_per_slice + i, 0)),
                pl.BlockSpec((n_fft, 2 * n_freq_pad), lambda c, i: (0, 0)),
            ],
            out_specs=pl.BlockSpec((1, 1, 1), lambda c, i: (c, 0, 0)),
            scratch_shapes=[pltpu.VMEM((block_rows, n_freq_pad), jnp.float32)],
        ),
        compiler_params=pltpu.CompilerParams(
            dimension_semantics=("parallel", "arbitrary"),
            vmem_limit_bytes=vmem_limit),
    )(frames_t, frames_p, basis)

    total = jnp.sum(partials)
    # mean over the real (unpadded) (B, n_freq, n_frames) tensor
    return total / jnp.float32(B * n_freq * n_frames)


def phase_only_loss(target, pred, n_fft=1024, hop_length=256,
                    block_rows=256, num_parallel=None):
    if num_parallel is None:
        num_parallel = _default_num_parallel()
    n_freq = n_fft // 2 + 1
    n_freq_pad = ((n_freq + 127) // 128) * 128
    basis = _fused_dft_basis(n_fft, n_freq_pad)      # cached bf16 constant
    return _phase_only_loss_impl(
        target, pred, basis, n_fft=n_fft, hop_length=hop_length,
        block_rows=block_rows, num_parallel=num_parallel)


# --------------------------- pure-JAX reference ------------------------------ #
def _reference(target, pred, n_fft, hop):
    frames_t, _ = _frame(target.astype(jnp.float32), n_fft, hop)
    frames_p, _ = _frame(pred.astype(jnp.float32), n_fft, hop)
    n_freq = n_fft // 2 + 1
    n = jnp.arange(n_fft, dtype=jnp.float32)
    k = jnp.arange(n_freq, dtype=jnp.float32)
    win = 0.5 * (1.0 - jnp.cos(2.0 * jnp.pi * n / n_fft))
    ang = 2.0 * jnp.pi * n[:, None] * k[None, :] / n_fft
    cosb = win[:, None] * jnp.cos(ang)
    sinb = -win[:, None] * jnp.sin(ang)
    phi_t = jnp.arctan2(frames_t @ sinb, frames_t @ cosb)
    phi_p = jnp.arctan2(frames_p @ sinb, frames_p @ cosb)
    delta = jnp.arctan2(jnp.sin(phi_p - phi_t), jnp.cos(phi_p - phi_t))
    return jnp.mean(1.0 - jnp.cos(delta))


if __name__ == "__main__":
    key = jax.random.PRNGKey(0)
    k1, k2 = jax.random.split(key)
    B, T = 2, 512
    n_fft, hop = 128, 32   # small, STFT-consistent shapes for the demo

    target = jax.random.uniform(k1, (B, T), jnp.float32, -1.0, 1.0)
    pred = jax.random.uniform(k2, (B, T), jnp.float32, -1.0, 1.0)

    loss = phase_only_loss(target, pred, n_fft=n_fft, hop_length=hop)
    loss = jax.block_until_ready(loss)

    ref = _reference(target, pred, n_fft, hop)
    assert jnp.isfinite(loss), "kernel produced non-finite loss"
    # bf16 matmul operands -> relaxed tolerance vs the f32 reference.
    assert jnp.allclose(loss, ref, rtol=2e-2, atol=2e-3), (loss, ref)

    print("KERNEL_OK")
</pallas_src>

<mosaic_0001>
module attributes {stable_mosaic.version = 11 : i64} {
  func.func @_phase_loss_kernel(%arg0: i32, %arg1: i32, %arg2: memref<256x128xbf16, #tpu.memory_space<vmem>>, %arg3: memref<256x128xbf16, #tpu.memory_space<vmem>>, %arg4: memref<128x256xbf16, #tpu.memory_space<vmem>>, %arg5: memref<1x1x1xf32, #tpu.memory_space<vmem>>, %arg6: memref<256x128xf32, #tpu.memory_space<vmem>>) attributes {dimension_semantics = [#tpu.dimension_semantics<parallel>, #tpu.dimension_semantics<arbitrary>], iteration_bounds = array<i64: 1, 1>, scalar_prefetch = 0 : i64, scratch_operands = 1 : i64, tpu.core_type = #tpu.core_type<tc>, window_params = [{transform_indices = @transform_0, window_bounds = array<i64: 256, 128>}, {transform_indices = @transform_1, window_bounds = array<i64: 256, 128>}, {pipeline_mode = #tpu.pipeline_mode<synchronous>, transform_indices = @transform_2, window_bounds = array<i64: 128, 256>}, {transform_indices = @transform_3, window_bounds = array<i64: 1, 1, 1>}]} {
    %c0_i32 = arith.constant 0 : i32
    %0 = arith.cmpi eq, %arg1, %c0_i32 : i32
    %1 = arith.extui %0 : i1 to i32
    %c0_i32_0 = arith.constant 0 : i32
    %2 = arith.cmpi ne, %1, %c0_i32_0 : i32
    scf.if %2 {
      %cst_20 = arith.constant 0.000000e+00 : f32
      %44 = vector.broadcast %cst_20 : f32 to vector<256x128xf32>
      %c0_21 = arith.constant 0 : index
      %c0_22 = arith.constant 0 : index
      %45 = vector.load %arg6[%c0_21, %c0_22] : memref<256x128xf32, #tpu.memory_space<vmem>>, vector<256x128xf32>
      tpu.vector_store %arg6[%c0_21, %c0_22], %44 {strides = array<i32>} : memref<256x128xf32, #tpu.memory_space<vmem>>, vector<256x128xf32>,
    } else {
    }
    %c0 = arith.constant 0 : index
    %c0_1 = arith.constant 0 : index
    %3 = vector.load %arg4[%c0, %c0_1] : memref<128x256xbf16, #tpu.memory_space<vmem>>, vector<128x256xbf16>
    %c0_2 = arith.constant 0 : index
    %c0_3 = arith.constant 0 : index
    %4 = vector.load %arg2[%c0_2, %c0_3] : memref<256x128xbf16, #tpu.memory_space<vmem>>, vector<256x128xbf16>
    %cst = arith.constant dense<0.000000e+00> : vector<256x256xf32>
    %5 = tpu.matmul %4, %3, %cst {dimension_numbers = #tpu.dot_dimension_numbers<[1], [0], [0], [1], [0, 0, 1, 1], [], []>} : vector<256x128xbf16>, vector<128x256xbf16>, vector<256x256xf32> -> vector<256x256xf32>
    %c0_4 = arith.constant 0 : index
    %c0_5 = arith.constant 0 : index
    %6 = vector.load %arg3[%c0_4, %c0_5] : memref<256x128xbf16, #tpu.memory_space<vmem>>, vector<256x128xbf16>
    %cst_6 = arith.constant dense<0.000000e+00> : vector<256x256xf32>
    %7 = tpu.matmul %6, %3, %cst_6 {dimension_numbers = #tpu.dot_dimension_numbers<[1], [0], [0], [1], [0, 0, 1, 1], [], []>} : vector<256x128xbf16>, vector<128x256xbf16>, vector<256x256xf32> -> vector<256x256xf32>
    %8 = vector.extract_strided_slice %5 {offsets = [0, 0], sizes = [256, 128], strides = [1, 1]} : vector<256x256xf32> to vector<256x128xf32>
    %9 = vector.extract_strided_slice %5 {offsets = [0, 128], sizes = [256, 128], strides = [1, 1]} : vector<256x256xf32> to vector<256x128xf32>
    %10 = vector.extract_strided_slice %7 {offsets = [0, 0], sizes = [256, 128], strides = [1, 1]} : vector<256x256xf32> to vector<256x128xf32>
    %11 = vector.extract_strided_slice %7 {offsets = [0, 128], sizes = [256, 128], strides = [1, 1]} : vector<256x256xf32> to vector<256x128xf32>
    %12 = arith.mulf %8, %8 : vector<256x128xf32>
    %13 = arith.mulf %9, %9 : vector<256x128xf32>
    %14 = arith.addf %12, %13 : vector<256x128xf32>
    %15 = arith.mulf %10, %10 : vector<256x128xf32>
    %16 = arith.mulf %11, %11 : vector<256x128xf32>
    %17 = arith.addf %15, %16 : vector<256x128xf32>
    %cst_7 = arith.constant 0.000000e+00 : f32
    %18 = vector.broadcast %cst_7 : f32 to vector<256x128xf32>
    %19 = arith.cmpf ogt, %14, %18 : vector<256x128xf32>
    %cst_8 = arith.constant 0.000000e+00 : f32
    %20 = vector.broadcast %cst_8 : f32 to vector<256x128xf32>
    %21 = arith.cmpf ogt, %17, %20 : vector<256x128xf32>
    %cst_9 = arith.constant 1.000000e+00 : f32
    %22 = vector.broadcast %cst_9 : f32 to vector<256x128xf32>
    %23 = arith.select %21, %10, %22 : vector<256x128xi1>, vector<256x128xf32>
    %cst_10 = arith.constant 1.000000e+00 : f32
    %24 = vector.broadcast %cst_10 : f32 to vector<256x128xf32>
    %25 = arith.select %19, %8, %24 : vector<256x128xi1>, vector<256x128xf32>
    %26 = arith.mulf %23, %25 : vector<256x128xf32>
    %27 = arith.mulf %11, %9 : vector<256x128xf32>
    %28 = arith.addf %26, %27 : vector<256x128xf32>
    %cst_11 = arith.constant 1.000000e+00 : f32
    %29 = vector.broadcast %cst_11 : f32 to vector<256x128xf32>
    %30 = arith.select %19, %14, %29 : vector<256x128xi1>, vector<256x128xf32>
    %cst_12 = arith.constant 1.000000e+00 : f32
    %31 = vector.broadcast %cst_12 : f32 to vector<256x128xf32>
    %32 = arith.select %21, %17, %31 : vector<256x128xi1>, vector<256x128xf32>
    %33 = arith.mulf %30, %32 : vector<256x128xf32>
    %c0_13 = arith.constant 0 : index
    %c0_14 = arith.constant 0 : index
    %34 = vector.load %arg6[%c0_13, %c0_14] : memref<256x128xf32, #tpu.memory_space<vmem>>, vector<256x128xf32>
    %35 = math.rsqrt %33 : vector<256x128xf32>
    %36 = arith.mulf %28, %35 : vector<256x128xf32>
    %cst_15 = arith.constant 1.000000e+00 : f32
    %37 = vector.broadcast %cst_15 : f32 to vector<256x128xf32>
    %38 = arith.subf %37, %36 : vector<256x128xf32>
    %39 = arith.addf %34, %38 : vector<256x128xf32>
    %c0_16 = arith.constant 0 : index
    %c0_17 = arith.constant 0 : index
    %40 = vector.load %arg6[%c0_16, %c0_17] : memref<256x128xf32, #tpu.memory_space<vmem>>, vector<256x128xf32>
    tpu.vector_store %arg6[%c0_16, %c0_17], %39 {strides = array<i32>} : memref<256x128xf32, #tpu.memory_space<vmem>>, vector<256x128xf32>,
    %c0_i32_18 = arith.constant 0 : i32
    %41 = arith.cmpi eq, %arg1, %c0_i32_18 : i32
    %42 = arith.extui %41 : i1 to i32
    %c0_i32_19 = arith.constant 0 : i32
    %43 = arith.cmpi ne, %42, %c0_i32_19 : i32
    scf.if %43 {
      %c0_20 = arith.constant 0 : index
      %c0_21 = arith.constant 0 : index
      %44 = vector.load %arg6[%c0_20, %c0_21] : memref<256x128xf32, #tpu.memory_space<vmem>>, vector<256x128xf32>
      %45 = vector.shape_cast %44 : vector<256x128xf32> to vector<1x256x128xf32>
      %cst_22 = arith.constant dense<0.000000e+00> : vector<1xf32>
      %46 = vector.multi_reduction <add>, %45, %cst_22 [1, 2] : vector<1x256x128xf32> to vector<1xf32>
      %47 = vector.shape_cast %46 : vector<1xf32> to vector<1x1x1xf32>
      %48 = vector.extract %47[0, 0, 0] : f32 from vector<1x1x1xf32>
      %49 = vector.broadcast %48 : f32 to vector<1x1x1xf32>
      %c0_23 = arith.constant 0 : index
      %c0_24 = arith.constant 0 : index
      %c0_25 = arith.constant 0 : index
      %50 = vector.load %arg5[%c0_23, %c0_24, %c0_25] : memref<1x1x1xf32, #tpu.memory_space<vmem>>, vector<1x1x1xf32>
      tpu.vector_store %arg5[%c0_23, %c0_24, %c0_25], %49 {strides = array<i32>} : memref<1x1x1xf32, #tpu.memory_space<vmem>>, vector<1x1x1xf32>,
    } else {
    }
    return
  }
  func.func @transform_0(%arg0: i32, %arg1: i32) -> (i32, i32) {
    %c1_i32 = arith.constant 1 : i32
    %0 = arith.muli %arg0, %c1_i32 : i32
    %1 = arith.addi %0, %arg1 : i32
    %c0_i32 = arith.constant 0 : i32
    %c0_i32_0 = arith.constant 0 : i32
    return %1, %c0_i32 : i32, i32
  }
  func.func @transform_1(%arg0: i32, %arg1: i32) -> (i32, i32) {
    %c1_i32 = arith.constant 1 : i32
    %0 = arith.muli %arg0, %c1_i32 : i32
    %1 = arith.addi %0, %arg1 : i32
    %c0_i32 = arith.constant 0 : i32
    %c0_i32_0 = arith.constant 0 : i32
    return %1, %c0_i32 : i32, i32
  }
  func.func @transform_2(%arg0: i32, %arg1: i32) -> (i32, i32) {
    %c0_i32 = arith.constant 0 : i32
    %c0_i32_0 = arith.constant 0 : i32
    %c0_i32_1 = arith.constant 0 : i32
    return %c0_i32, %c0_i32_0 : i32, i32
  }
  func.func @transform_3(%arg0: i32, %arg1: i32) -> (i32, i32, i32) {
    %c0_i32 = arith.constant 0 : i32
    %c0_i32_0 = arith.constant 0 : i32
    %c0_i32_1 = arith.constant 0 : i32
    return %arg0, %c0_i32, %c0_i32_0 : i32, i32, i32
  }
}

</mosaic_0001>

<bundles_post_ra>
// kernel: _phase_only_loss_impl.1
= control target key start
LH: loop header
LB: loop body
LE: loop exit
PB: predicated region body
PF: predicated region fallthrough
CT: control target
= control target key end

     0   :  { %v1838_v2 = vmov 0   ;;  %s2493_s0 = inlined_call_operand.vmem [shape: bf16[256,128], index: 0, kind: input, shape index: {}]   ;;  %s2494_s1 = inlined_call_operand.vmem [shape: bf16[256,128], index: 1, kind: input, shape index: {}]   ;;  %s2495_s2 = inlined_call_operand.vmem [shape: bf16[128,256], index: 2, kind: input, shape index: {}]   ;;  %s2496_s3 = inlined_call_operand.hbm [shape: f32[1,1,1], index: 3, kind: output, shape index: {}]  }
   0x1   :  { %v1694_v0 = vld [vmem:[%s2495_s2 + $0x4] ss:$8 sps:$4 sm:$0xff]   ;;  %v1696_v1 = vld [vmem:[%s2495_s2] ss:$8 sps:$4 sm:$0xff]   ;;  %352 = vmatprep.mubr.bf16.mxu0 %v1838_v2  ;;  %673 = vmatprep.mubr.bf16.mxu1 %v1838_v2  ;;  %v1697_v3 = vld [vmem:[%s2495_s2 + $0x14] ss:$8 sps:$4 sm:$0xff]  }
   0x2   :  { %320 = vmatprep.subr.bf16.mxu0 %v1694_v0  ;;  %641 = vmatprep.subr.bf16.mxu1 %v1694_v0  ;;  %v1699_v4 = vld [vmem:[%s2495_s2 + $0x10] ss:$8 sps:$4 sm:$0xff]   ;;  %v1700_v5 = vld [vmem:[%s2495_s2 + $0x24] ss:$8 sps:$4 sm:$0xff]   ;;  %v1702_v6 = vld [vmem:[%s2495_s2 + $0x20] ss:$8 sps:$4 sm:$0xff]  }
   0x3   :  { %321 = vmatpush1.bf16.msra.mxu0 %v1696_v1  ;;  %642 = vmatpush1.bf16.msra.mxu1 %v1696_v1  ;;  %v1703_v7 = vld [vmem:[%s2495_s2 + $0x34] ss:$8 sps:$4 sm:$0xff]   ;;  %v1705_v8 = vld [vmem:[%s2495_s2 + $0x30] ss:$8 sps:$4 sm:$0xff]   ;;  %v1706_v9 = vld [vmem:[%s2495_s2 + $0x44] ss:$8 sps:$4 sm:$0xff]  }
   0x4   :  { %322 = vmatprep.subr.bf16.mxu0 %v1697_v3  ;;  %643 = vmatprep.subr.bf16.mxu1 %v1697_v3  ;;  %v1708_v10 = vld [vmem:[%s2495_s2 + $0x40] ss:$8 sps:$4 sm:$0xff]   ;;  %v1709_v11 = vld [vmem:[%s2495_s2 + $0x54] ss:$8 sps:$4 sm:$0xff]   ;;  %v1711_v12 = vld [vmem:[%s2495_s2 + $0x50] ss:$8 sps:$4 sm:$0xff]  }
   0x5   :  { %v1712_v13 = vld [vmem:[%s2495_s2 + $0x64] ss:$8 sps:$4 sm:$0xff]   ;;  %v1714_v14 = vld [vmem:[%s2495_s2 + $0x60] ss:$8 sps:$4 sm:$0xff]   ;;  %v1715_v15 = vld [vmem:[%s2495_s2 + $0x74] ss:$8 sps:$4 sm:$0xff]  }
   0x6   :  { %v1717_v16 = vld [vmem:[%s2495_s2 + $0x70] ss:$8 sps:$4 sm:$0xff]   ;;  %v1718_v17 = vld [vmem:[%s2493_s0] sm:$0xff]   ;;  %v1720_v19 = vld [vmem:[%s2493_s0 + $0x8] sm:$0xff]  }
   0x7   :  { %323 = vmatpush1.bf16.msra.mxu0 %v1699_v4  ;;  %644 = vmatpush1.bf16.msra.mxu1 %v1699_v4  ;;  %v1719_v18 = vld [vmem:[%s2494_s1] sm:$0xff]   ;;  %v1721_v20 = vld [vmem:[%s2494_s1 + $0x8] sm:$0xff]  }
   0x8   :  { %324 = vmatprep.subr.bf16.mxu0 %v1700_v5  ;;  %645 = vmatprep.subr.bf16.mxu1 %v1700_v5 }
   0xb   :  { %325 = vmatpush1.bf16.msra.mxu0 %v1702_v6  ;;  %646 = vmatpush1.bf16.msra.mxu1 %v1702_v6 }
   0xc   :  { %326 = vmatprep.subr.bf16.mxu0 %v1703_v7  ;;  %647 = vmatprep.subr.bf16.mxu1 %v1703_v7 }
   0xf   :  { %327 = vmatpush1.bf16.msra.mxu0 %v1705_v8  ;;  %648 = vmatpush1.bf16.msra.mxu1 %v1705_v8 }
  0x10   :  { %328 = vmatprep.subr.bf16.mxu0 %v1706_v9  ;;  %649 = vmatprep.subr.bf16.mxu1 %v1706_v9 }
  0x13   :  { %329 = vmatpush1.bf16.msra.mxu0 %v1708_v10  ;;  %650 = vmatpush1.bf16.msra.mxu1 %v1708_v10 }
  0x14   :  { %330 = vmatprep.subr.bf16.mxu0 %v1709_v11  ;;  %651 = vmatprep.subr.bf16.mxu1 %v1709_v11 }
  0x17   :  { %331 = vmatpush1.bf16.msra.mxu0 %v1711_v12  ;;  %652 = vmatpush1.bf16.msra.mxu1 %v1711_v12 }
  0x18   :  { %332 = vmatprep.subr.bf16.mxu0 %v1712_v13  ;;  %653 = vmatprep.subr.bf16.mxu1 %v1712_v13 }
  0x1b   :  { %333 = vmatpush1.bf16.msra.mxu0 %v1714_v14  ;;  %654 = vmatpush1.bf16.msra.mxu1 %v1714_v14 }
  0x1c   :  { %334 = vmatprep.subr.bf16.mxu0 %v1715_v15  ;;  %655 = vmatprep.subr.bf16.mxu1 %v1715_v15 }
  0x1f   :  { %335 = vmatpush1.bf16.msra.mxu0 %v1717_v16  ;;  %656 = vmatpush1.bf16.msra.mxu1 %v1717_v16 }
  0x22   :  { %353 = vmatmul.mubr.bf16.vlgmr.msra.gmra.mrb[0].mxu0 %v1718_v17  ;;  %674 = vmatmul.mubr.bf16.vlgmr.msra.gmra.mrb[0].mxu1 %v1719_v18 }
  0x23   :  { %362 = vmatprep.mubr.bf16.mxu0 %v1838_v2  ;;  %683 = vmatprep.mubr.bf16.mxu1 %v1838_v2 }
  0x2a   :  { %363 = vmatmul.mubr.bf16.gmra.mrb[4].mxu0 %v1720_v19  ;;  %684 = vmatmul.mubr.bf16.gmra.mrb[4].mxu1 %v1721_v20 }
  0x2b   :  { %8 = vsyncpa [#allocation4], 0  ;;  %372 = vmatprep.mubr.bf16.mxu0 %v1838_v2  ;;  %693 = vmatprep.mubr.bf16.mxu1 %v1838_v2  ;;  %v1722_v21 = vld [vmem:[%s2493_s0 + $0x10] sm:$0xff]   ;;  %v1724_v23 = vld [vmem:[%s2493_s0 + $0x18] sm:$0xff]  }
  0x2c   :  { %v1723_v22 = vld [vmem:[%s2494_s1 + $0x10] sm:$0xff]   ;;  %v1725_v24 = vld [vmem:[%s2494_s1 + $0x18] sm:$0xff]   ;;  %v1726_v25 = vld [vmem:[%s2493_s0 + $0x20] sm:$0xff]  }
  0x2d   :  { %v1727_v26 = vld [vmem:[%s2494_s1 + $0x20] sm:$0xff]   ;;  %v1728_v27 = vld [vmem:[%s2493_s0 + $0x28] sm:$0xff]   ;;  %v1730_v29 = vld [vmem:[%s2493_s0 + $0x30] sm:$0xff]  }
  0x2e   :  { %v1729_v28 = vld [vmem:[%s2494_s1 + $0x28] sm:$0xff]   ;;  %v1731_v30 = vld [vmem:[%s2494_s1 + $0x30] sm:$0xff]   ;;  %v1732_v31 = vld [vmem:[%s2493_s0 + $0x38] sm:$0xff]  }
  0x2f   :  { %v1733_v32 = vld [vmem:[%s2494_s1 + $0x38] sm:$0xff]   ;;  %v1734_v33 = vld [vmem:[%s2493_s0 + $0x40] sm:$0xff]   ;;  %v1736_v35 = vld [vmem:[%s2493_s0 + $0x48] sm:$0xff]  }
  0x30   :  { %v1735_v34 = vld [vmem:[%s2494_s1 + $0x40] sm:$0xff]   ;;  %v1737_v36 = vld [vmem:[%s2494_s1 + $0x48] sm:$0xff]   ;;  %v1738_v37 = vld [vmem:[%s2493_s0 + $0x50] sm:$0xff]  }
  0x31   :  { %v1739_v38 = vld [vmem:[%s2494_s1 + $0x50] sm:$0xff]   ;;  %v1740_v39 = vld [vmem:[%s2493_s0 + $0x58] sm:$0xff]   ;;  %v1742_v41 = vld [vmem:[%s2493_s0 + $0x60] sm:$0xff]  }
  0x32   :  { %373 = vmatmul.mubr.bf16.gmra.mrb[8].mxu0 %v1722_v21  ;;  %694 = vmatmul.mubr.bf16.gmra.mrb[8].mxu1 %v1723_v22  ;;  %v1741_v40 = vld [vmem:[%s2494_s1 + $0x58] sm:$0xff]   ;;  %v1743_v42 = vld [vmem:[%s2494_s1 + $0x60] sm:$0xff]   ;;  %v1744_v43 = vld [vmem:[%s2493_s0 + $0x68] sm:$0xff]  }
  0x33   :  { %382 = vmatprep.mubr.bf16.mxu0 %v1838_v2  ;;  %703 = vmatprep.mubr.bf16.mxu1 %v1838_v2  ;;  %v1745_v44 = vld [vmem:[%s2494_s1 + $0x68] sm:$0xff]   ;;  %v1746_v45 = vld [vmem:[%s2493_s0 + $0x70] sm:$0xff]   ;;  %v1748_v47 = vld [vmem:[%s2493_s0 + $0x78] sm:$0xff]   ;;  %s1839_s0 = smov [#allocation3]  }
  0x34   :  { %v1747_v46 = vld [vmem:[%s2494_s1 + $0x70] sm:$0xff]   ;;  %v1749_v48 = vld [vmem:[%s2494_s1 + $0x78] sm:$0xff]   ;;  %s1622_s1 = sshll.u32 %s1839_s0, 4  ;;  %s1623_s1 = int_to_ptr.vmem [resolvable:$true] %s1622_s1 }
  0x35   :  { %s1814_s25 = scalar_lea.vmem %s1623_s1, 16  ;;  %s1818_s26 = scalar_lea.vmem %s1623_s1, 32 }
  0x36   :  { %p1815_p0 = scmp.ne.s32.totalorder %s1623_s1, %s1814_s25  ;;  %p1819_p1 = scmp.lt.s32.totalorder %s1623_s1, %s1623_s1 }
  0x37   :  { %p1820_p2 = scmp.lt.s32.totalorder %s1818_s26, %s1814_s25 }
  0x39   :  { %p1821_p3 = por %p1820_p2, %p1819_p1 }
  0x3a   :  { %383 = vmatmul.mubr.bf16.gmra.mrb[12].mxu0 %v1724_v23  ;;  %704 = vmatmul.mubr.bf16.gmra.mrb[12].mxu1 %v1725_v24 }
  0x3b   :  { %392 = vmatprep.mubr.bf16.mxu0 %v1838_v2  ;;  %713 = vmatprep.mubr.bf16.mxu1 %v1838_v2  ;;  %p1822_p4 = pnand %p1821_p3, %p1815_p0 }
  0x42   :  { %393 = vmatmul.mubr.bf16.gmra.mrb[16].mxu0 %v1726_v25  ;;  %714 = vmatmul.mubr.bf16.gmra.mrb[16].mxu1 %v1727_v26 }
  0x43   :  { %402 = vmatprep.mubr.bf16.mxu0 %v1838_v2  ;;  %723 = vmatprep.mubr.bf16.mxu1 %v1838_v2 }
  0x4a   :  { %403 = vmatmul.mubr.bf16.gmra.mrb[20].mxu0 %v1728_v27  ;;  %724 = vmatmul.mubr.bf16.gmra.mrb[20].mxu1 %v1729_v28 }
  0x4b   :  { %412 = vmatprep.mubr.bf16.mxu0 %v1838_v2  ;;  %733 = vmatprep.mubr.bf16.mxu1 %v1838_v2 }
  0x52   :  { %413 = vmatmul.mubr.bf16.gmra.mrb[24].mxu0 %v1730_v29  ;;  %734 = vmatmul.mubr.bf16.gmra.mrb[24].mxu1 %v1731_v30 }
  0x53   :  { %422 = vmatprep.mubr.bf16.mxu0 %v1838_v2  ;;  %743 = vmatprep.mubr.bf16.mxu1 %v1838_v2 }
  0x5a   :  { %423 = vmatmul.mubr.bf16.gmra.mrb[28].mxu0 %v1732_v31  ;;  %744 = vmatmul.mubr.bf16.gmra.mrb[28].mxu1 %v1733_v32 }
  0x5b   :  { %432 = vmatprep.mubr.bf16.mxu0 %v1838_v2  ;;  %753 = vmatprep.mubr.bf16.mxu1 %v1838_v2 }
  0x62   :  { %433 = vmatmul.mubr.bf16.gmra.mrb[32].mxu0 %v1734_v33  ;;  %754 = vmatmul.mubr.bf16.gmra.mrb[32].mxu1 %v1735_v34 }
  0x63   :  { %442 = vmatprep.mubr.bf16.mxu0 %v1838_v2  ;;  %763 = vmatprep.mubr.bf16.mxu1 %v1838_v2 }
  0x6a   :  { %443 = vmatmul.mubr.bf16.gmra.mrb[36].mxu0 %v1736_v35  ;;  %764 = vmatmul.mubr.bf16.gmra.mrb[36].mxu1 %v1737_v36 }
  0x6b   :  { %452 = vmatprep.mubr.bf16.mxu0 %v1838_v2  ;;  %773 = vmatprep.mubr.bf16.mxu1 %v1838_v2 }
  0x72   :  { %453 = vmatmul.mubr.bf16.gmra.mrb[40].mxu0 %v1738_v37  ;;  %774 = vmatmul.mubr.bf16.gmra.mrb[40].mxu1 %v1739_v38 }
  0x73   :  { %462 = vmatprep.mubr.bf16.mxu0 %v1838_v2  ;;  %783 = vmatprep.mubr.bf16.mxu1 %v1838_v2 }
  0x7a   :  { %463 = vmatmul.mubr.bf16.gmra.mrb[44].mxu0 %v1740_v39  ;;  %784 = vmatmul.mubr.bf16.gmra.mrb[44].mxu1 %v1741_v40 }
  0x7b   :  { %472 = vmatprep.mubr.bf16.mxu0 %v1838_v2  ;;  %793 = vmatprep.mubr.bf16.mxu1 %v1838_v2 }
  0x82   :  { %473 = vmatmul.mubr.bf16.gmra.mrb[48].mxu0 %v1742_v41  ;;  %794 = vmatmul.mubr.bf16.gmra.mrb[48].mxu1 %v1743_v42 }
  0x83   :  { %482 = vmatprep.mubr.bf16.mxu0 %v1838_v2  ;;  %803 = vmatprep.mubr.bf16.mxu1 %v1838_v2 }
  0x8a   :  { %483 = vmatmul.mubr.bf16.gmra.mrb[52].mxu0 %v1744_v43  ;;  %804 = vmatmul.mubr.bf16.gmra.mrb[52].mxu1 %v1745_v44 }
  0x8b   :  { %492 = vmatprep.mubr.bf16.mxu0 %v1838_v2  ;;  %813 = vmatprep.mubr.bf16.mxu1 %v1838_v2 }
  0x92   :  { %493 = vmatmul.mubr.bf16.gmra.mrb[56].mxu0 %v1746_v45  ;;  %814 = vmatmul.mubr.bf16.gmra.mrb[56].mxu1 %v1747_v46 }
  0x93   :  { %502 = vmatprep.mubr.bf16.mxu0 %v1838_v2  ;;  %823 = vmatprep.mubr.bf16.mxu1 %v1838_v2 }
  0x9a   :  { %503 = vmatmul.mubr.bf16.gmra.mrb[60].mxu0 %v1748_v47  ;;  %824 = vmatmul.mubr.bf16.gmra.mrb[60].mxu1 %v1749_v48 }
  0xf5   :  { %v354_v49 = vpop.f32.mrb[0].mxu0  ;;  %v675_v50 = vpop.f32.mrb[0].mxu1 }
  0xf6   :  { %v834_v51 = vmul.f32 %v354_v49, %v354_v49  ;;  %v930_v52 = vmul.f32 %v675_v50, %v675_v50  ;;  %v356_v53 = vpop.f32.mrb[1].mxu0  ;;  %v677_v54 = vpop.f32.mrb[1].mxu1 }
  0xf7   :  { %v866_v55 = vmul.f32 %v356_v53, %v356_v53  ;;  %v962_v56 = vmul.f32 %v677_v54, %v677_v54  ;;  %v1186_v57 = vmul.f32 %v677_v54, %v356_v53  ;;  %v358_v58 = vpop.f32.mrb[2].mxu0  ;;  %v679_v59 = vpop.f32.mrb[2].mxu1 }
  0xf8   :  { %v835_v60 = vmul.f32 %v358_v58, %v358_v58  ;;  %v931_v61 = vmul.f32 %v679_v59, %v679_v59  ;;  %v360_v62 = vpop.f32.mrb[3].mxu0  ;;  %v681_v63 = vpop.f32.mrb[3].mxu1 }
  0xf9   :  { %v898_v0 = vadd.f32 %v866_v55, %v834_v51  ;;  %v994_v1 = vadd.f32 %v962_v56, %v930_v52  ;;  %v867_v2 = vmul.f32 %v360_v62, %v360_v62  ;;  %v963_v3 = vmul.f32 %v681_v63, %v681_v63 }
  0xfa   :  { %v1187_v4 = vmul.f32 %v681_v63, %v360_v62 }
  0xfb   :  { %vm1026_vm0 = vcmp.gt.f32.partialorder %v898_v0, 0.0  ;;  %vm1058_vm1 = vcmp.gt.f32.partialorder %v994_v1, 0.0  ;;  %v899_v5 = vadd.f32 %v867_v2, %v835_v60  ;;  %v995_v6 = vadd.f32 %v963_v3, %v931_v61 }
  0xfc   :  { %v1250_v7 = vsel %vm1026_vm0, %v898_v0, 1.0  ;;  %v1090_v8 = vsel %vm1058_vm1, %v675_v50, 1.0  ;;  %v1122_v9 = vsel %vm1026_vm0, %v354_v49, 1.0  ;;  %v1282_v10 = vsel %vm1058_vm1, %v994_v1, 1.0 }
  0xfd   :  { %v1154_v11 = vmul.f32 %v1122_v9, %v1090_v8  ;;  %v1314_v12 = vmul.f32 %v1282_v10, %v1250_v7  ;;  %vm1027_vm2 = vcmp.gt.f32.partialorder %v899_v5, 0.0  ;;  %vm1059_vm3 = vcmp.gt.f32.partialorder %v995_v6, 0.0  ;;  %v364_v13 = vpop.f32.mrb[4].mxu0  ;;  %v685_v14 = vpop.f32.mrb[4].mxu1 }
  0xfe   :  { %v1251_v15 = vsel %vm1027_vm2, %v899_v5, 1.0  ;;  %v1091_v16 = vsel %vm1059_vm3, %v679_v59, 1.0  ;;  %v1123_v17 = vsel %vm1027_vm2, %v358_v58, 1.0  ;;  %v1283_v18 = vsel %vm1059_vm3, %v995_v6, 1.0  ;;  %v366_v19 = vpop.f32.mrb[5].mxu0  ;;  %v687_v20 = vpop.f32.mrb[5].mxu1 }
  0xff   :  { %v1218_v21 = vadd.f32 %v1186_v57, %v1154_v11  ;;  %1750 = vrsqrt.f32 %v1314_v12  ;;  %v1155_v22 = vmul.f32 %v1123_v17, %v1091_v16  ;;  %v1315_v23 = vmul.f32 %v1283_v18, %v1251_v15  ;;  %v368_v24 = vpop.f32.mrb[6].mxu0  ;;  %v689_v25 = vpop.f32.mrb[6].mxu1 }
 0x100   :  { %v836_v26 = vmul.f32 %v364_v13, %v364_v13  ;;  %v932_v27 = vmul.f32 %v685_v14, %v685_v14  ;;  %v868_v28 = vmul.f32 %v366_v19, %v366_v19  ;;  %v964_v29 = vmul.f32 %v687_v20, %v687_v20  ;;  %v370_v30 = vpop.f32.mrb[7].mxu0  ;;  %v691_v31 = vpop.f32.mrb[7].mxu1 }
 0x101   :  { %v1219_v32 = vadd.f32 %v1187_v4, %v1155_v22  ;;  %1752 = vrsqrt.f32 %v1315_v23  ;;  %v1188_v33 = vmul.f32 %v687_v20, %v366_v19  ;;  %v837_v34 = vmul.f32 %v368_v24, %v368_v24 }
 0x102   :  { %v900_v35 = vadd.f32 %v868_v28, %v836_v26  ;;  %v996_v36 = vadd.f32 %v964_v29, %v932_v27  ;;  %v933_v37 = vmul.f32 %v689_v25, %v689_v25  ;;  %v869_v38 = vmul.f32 %v370_v30, %v370_v30 }
 0x103   :  { %v965_v39 = vmul.f32 %v691_v31, %v691_v31  ;;  %v1189_v40 = vmul.f32 %v691_v31, %v370_v30 }
 0x104   :  { %vm1028_vm4 = vcmp.gt.f32.partialorder %v900_v35, 0.0  ;;  %vm1060_vm5 = vcmp.gt.f32.partialorder %v996_v36, 0.0  ;;  %v901_v41 = vadd.f32 %v869_v38, %v837_v34 }
 0x105   :  { %v1252_v42 = vsel %vm1028_vm4, %v900_v35, 1.0  ;;  %v1092_v43 = vsel %vm1060_vm5, %v685_v14, 1.0  ;;  %v1124_v44 = vsel %vm1028_vm4, %v364_v13, 1.0  ;;  %v1284_v45 = vsel %vm1060_vm5, %v996_v36, 1.0  ;;  %v374_v46 = vpop.f32.mrb[8].mxu0  ;;  %v695_v47 = vpop.f32.mrb[8].mxu1 }
 0x106   :  { %v1156_v48 = vmul.f32 %v1124_v44, %v1092_v43  ;;  %v1316_v49 = vmul.f32 %v1284_v45, %v1252_v42  ;;  %vm1029_vm6 = vcmp.gt.f32.partialorder %v901_v41, 0.0  ;;  %v997_v50 = vadd.f32 %v965_v39, %v933_v37  ;;  %v376_v51 = vpop.f32.mrb[9].mxu0  ;;  %v697_v52 = vpop.f32.mrb[9].mxu1 }
 0x107   :  { %v1253_v53 = vsel %vm1029_vm6, %v901_v41, 1.0  ;;  %v1125_v54 = vsel %vm1029_vm6, %v368_v24, 1.0  ;;  %v838_v55 = vmul.f32 %v374_v46, %v374_v46  ;;  %v934_v56 = vmul.f32 %v695_v47, %v695_v47  ;;  %v378_v57 = vpop.f32.mrb[10].mxu0  ;;  %v699_v58 = vpop.f32.mrb[10].mxu1 }
 0x108   :  { %v1220_v59 = vadd.f32 %v1188_v33, %v1156_v48  ;;  %1754 = vrsqrt.f32 %v1316_v49  ;;  %vm1061_vm7 = vcmp.gt.f32.partialorder %v997_v50, 0.0  ;;  %v870_v60 = vmul.f32 %v376_v51, %v376_v51  ;;  %v380_v61 = vpop.f32.mrb[11].mxu0  ;;  %v701_v62 = vpop.f32.mrb[11].mxu1 }
 0x109   :  { %v1751_v63 = vpop.eup %1750  ;;  %v1093_v0 = vsel %vm1061_vm7, %v689_v25, 1.0  ;;  %v1285_v1 = vsel %vm1061_vm7, %v997_v50, 1.0  ;;  %v966_v2 = vmul.f32 %v697_v52, %v697_v52  ;;  %v1190_v3 = vmul.f32 %v697_v52, %v376_v51 }
 0x10a   :  { %v1410_v4 = vmul.f32 %v1751_v63, %v1218_v21  ;;  %v1157_v5 = vmul.f32 %v1125_v54, %v1093_v0  ;;  %v1317_v6 = vmul.f32 %v1285_v1, %v1253_v53  ;;  %v902_v7 = vadd.f32 %v870_v60, %v838_v55 }
 0x10b   :  { %v1753_v8 = vpop.eup %1752  ;;  %v998_v9 = vadd.f32 %v966_v2, %v934_v56  ;;  %v839_v10 = vmul.f32 %v378_v57, %v378_v57  ;;  %v935_v11 = vmul.f32 %v699_v58, %v699_v58  ;;  %v871_v12 = vmul.f32 %v380_v61, %v380_v61 }
 0x10c   :  { %v1442_v13 = vsub.f32 1.0, %v1410_v4  ;;  %v1411_v14 = vmul.f32 %v1753_v8, %v1219_v32  ;;  %v1221_v15 = vadd.f32 %v1189_v40, %v1157_v5  ;;  %1756 = vrsqrt.f32 %v1317_v6 }
 0x10d   :  { %vm1030_vm8 = vcmp.gt.f32.partialorder %v902_v7, 0.0  ;;  %vm1062_vm9 = vcmp.gt.f32.partialorder %v998_v9, 0.0  ;;  %v903_v16 = vadd.f32 %v871_v12, %v839_v10  ;;  %v967_v17 = vmul.f32 %v701_v62, %v701_v62  ;;  %v384_v18 = vpop.f32.mrb[12].mxu0  ;;  %v705_v19 = vpop.f32.mrb[12].mxu1 }
 0x10e   :  { %v1443_v20 = vsub.f32 1.0, %v1411_v14  ;;  %v1254_v21 = vsel %vm1030_vm8, %v902_v7, 1.0  ;;  %v1094_v22 = vsel %vm1062_vm9, %v695_v47, 1.0  ;;  %v1126_v23 = vsel %vm1030_vm8, %v374_v46, 1.0  ;;  %v386_v24 = vpop.f32.mrb[13].mxu0  ;;  %v707_v25 = vpop.f32.mrb[13].mxu1 }
 0x10f   :  { %v1158_v26 = vmul.f32 %v1126_v23, %v1094_v22  ;;  %v1286_v27 = vsel %vm1062_vm9, %v998_v9, 1.0  ;;  %vm1031_vm10 = vcmp.gt.f32.partialorder %v903_v16, 0.0  ;;  %v999_v28 = vadd.f32 %v967_v17, %v935_v11  ;;  %v388_v29 = vpop.f32.mrb[14].mxu0  ;;  %v2036_v30 = vpop.f32.mrb[14].mxu1 }
 0x110   :  { %v1573_v31 = vadd.f32 %v1443_v20, %v1442_v13  ;;  %v1318_v32 = vmul.f32 %v1286_v27, %v1254_v21  ;;  %v1255_v33 = vsel %vm1031_vm10, %v903_v16, 1.0  ;;  %v1127_v34 = vsel %vm1031_vm10, %v378_v57, 1.0  ;;  %v390_v35 = vpop.f32.mrb[15].mxu0  ;;  %v711_v36 = vpop.f32.mrb[15].mxu1 }
 0x111   :  { %v1222_v37 = vadd.f32 %v1190_v3, %v1158_v26  ;;  %vm1063_vm11 = vcmp.gt.f32.partialorder %v999_v28, 0.0  ;;  %v1191_v38 = vmul.f32 %v701_v62, %v380_v61  ;;  %v840_v39 = vmul.f32 %v384_v18, %v384_v18 }
 0x112   :  { %v1755_v40 = vpop.eup %1754  ;;  %1758 = vrsqrt.f32 %v1318_v32  ;;  %v1095_v41 = vsel %vm1063_vm11, %v699_v58, 1.0  ;;  %v1287_v42 = vsel %vm1063_vm11, %v999_v28, 1.0  ;;  %v936_v43 = vmul.f32 %v705_v19, %v705_v19 }
 0x113   :  { %v1412_v44 = vmul.f32 %v1755_v40, %v1220_v59  ;;  %v1159_v45 = vmul.f32 %v1127_v34, %v1095_v41  ;;  %v1319_v46 = vmul.f32 %v1287_v42, %v1255_v33  ;;  %v872_v47 = vmul.f32 %v386_v24, %v386_v24 }
 0x114   :  { %v968_v48 = vmul.f32 %v707_v25, %v707_v25  ;;  %v1192_v49 = vmul.f32 %v707_v25, %v386_v24  ;;  %v841_v50 = vmul.f32 %v388_v29, %v388_v29  ;;  %v937_v51 = vmul.f32 %v2036_v30, %v2036_v30 }
 0x115   :  { %v1444_v52 = vsub.f32 1.0, %v1412_v44  ;;  %v1223_v53 = vadd.f32 %v1191_v38, %v1159_v45  ;;  %1760 = vrsqrt.f32 %v1319_v46  ;;  %v904_v54 = vadd.f32 %v872_v47, %v840_v39  ;;  %v2040_v55 = vpop.f32.mrb[16].mxu0  ;;  %v2042_v56 = vpop.f32.mrb[16].mxu1 }
 0x116   :  { %v1757_v57 = vpop.eup %1756  ;;  %v1000_v58 = vadd.f32 %v968_v48, %v936_v43  ;;  %v873_v59 = vmul.f32 %v390_v35, %v390_v35  ;;  %v969_v60 = vmul.f32 %v711_v36, %v711_v36  ;;  %v1193_v61 = vmul.f32 %v711_v36, %v390_v35  ;;  %v396_v62 = vpop.f32.mrb[17].mxu0 }
 0x117   :  { %v717_v63 = vpop.f32.mrb[17].mxu1  ;;  %v1574_v0 = vadd.f32 %v1573_v31, %v1444_v52  ;;  %v1413_v1 = vmul.f32 %v1757_v57, %v1221_v15  ;;  %vm1032_vm12 = vcmp.gt.f32.partialorder %v904_v54, 0.0  ;;  %v842_v2 = vmul.f32 %v2040_v55, %v2040_v55  ;;  %v2046_v3 = vpop.f32.mrb[18].mxu0 }
 0x118   :  { %v2048_v4 = vpop.f32.mrb[18].mxu1  ;;  %v1256_v5 = vsel %vm1032_vm12, %v904_v54, 1.0  ;;  %vm1064_vm13 = vcmp.gt.f32.partialorder %v1000_v58, 0.0  ;;  %v1128_v6 = vsel %vm1032_vm12, %v384_v18, 1.0  ;;  %v905_v7 = vadd.f32 %v873_v59, %v841_v50  ;;  %v400_v8 = vpop.f32.mrb[19].mxu0 }
 0x119   :  { %v721_v9 = vpop.f32.mrb[19].mxu1  ;;  %v1445_v10 = vsub.f32 1.0, %v1413_v1  ;;  %v1096_v11 = vsel %vm1064_vm13, %v705_v19, 1.0  ;;  %v1288_v12 = vsel %vm1064_vm13, %v1000_v58, 1.0  ;;  %v1001_v13 = vadd.f32 %v969_v60, %v937_v51 }
 0x11a   :  { %v1160_v14 = vmul.f32 %v1128_v6, %v1096_v11  ;;  %v1320_v15 = vmul.f32 %v1288_v12, %v1256_v5  ;;  %vm1033_vm14 = vcmp.gt.f32.partialorder %v905_v7, 0.0  ;;  %v938_v16 = vmul.f32 %v2042_v56, %v2042_v56 }
 0x11b   :  { %v1575_v17 = vadd.f32 %v1574_v0, %v1445_v10  ;;  %v1257_v20 = vsel %vm1033_vm14, %v905_v7, 1.0  ;;  %vm1065_vm15 = vcmp.gt.f32.partialorder %v1001_v13, 0.0  ;;  %v1129_v21 = vsel %vm1033_vm14, %v388_v29, 1.0 }
 0x11c   :  { %v1759_v22 = vpop.eup %1758  ;;  %v1224_v23 = vadd.f32 %v1192_v49, %v1160_v14  ;;  %1762 = vrsqrt.f32 %v1320_v15  ;;  %v1097_v18 = vsel %vm1065_vm15, %v2036_v30, 1.0  ;;  %v1289_v24 = vsel %vm1065_vm15, %v1001_v13, 1.0 }
 0x11d   :  { %v1414_v25 = vmul.f32 %v1759_v22, %v1222_v37  ;;  %v1161_v19 = vmul.f32 %v1129_v21, %v1097_v18  ;;  %v1321_v26 = vmul.f32 %v1289_v24, %v1257_v20  ;;  %v874_v27 = vmul.f32 %v396_v62, %v396_v62  ;;  %v2053_v28 = vpop.f32.mrb[20].mxu0  ;;  %v2055_v31 = vpop.f32.mrb[20].mxu1 }
 0x11e   :  { %v970_v32 = vmul.f32 %v717_v63, %v717_v63  ;;  %v1194_v33 = vmul.f32 %v717_v63, %v396_v62  ;;  %v843_v34 = vmul.f32 %v2046_v3, %v2046_v3  ;;  %v939_v29 = vmul.f32 %v2048_v4, %v2048_v4  ;;  %v406_v35 = vpop.f32.mrb[21].mxu0  ;;  %v727_v36 = vpop.f32.mrb[21].mxu1 }
 0x11f   :  { %v1761_v30 = vpop.eup %1760  ;;  %v1446_v38 = vsub.f32 1.0, %v1414_v25  ;;  %v1225_v37 = vadd.f32 %v1193_v61, %v1161_v19  ;;  %1764 = vrsqrt.f32 %v1321_v26  ;;  %v906_v39 = vadd.f32 %v874_v27, %v842_v2  ;;  %v2061_v40 = vpop.f32.mrb[22].mxu0 }
 0x120   :  { %v2063_v41 = vpop.f32.mrb[22].mxu1  ;;  %v1415_v42 = vmul.f32 %v1761_v30, %v1223_v53  ;;  %v1002_v43 = vadd.f32 %v970_v32, %v938_v16  ;;  %v875_v44 = vmul.f32 %v400_v8, %v400_v8  ;;  %v971_v45 = vmul.f32 %v721_v9, %v721_v9  ;;  %v2065_v46 = vpop.f32.mrb[23].mxu0 }
 0x121   :  { %v731_v47 = vpop.f32.mrb[23].mxu1  ;;  %v1576_v48 = vadd.f32 %v1575_v17, %v1446_v38  ;;  %vm1034_vm0 = vcmp.gt.f32.partialorder %v906_v39, 0.0  ;;  %v1195_v49 = vmul.f32 %v721_v9, %v400_v8  ;;  %v844_v50 = vmul.f32 %v2053_v28, %v2053_v28 }
 0x122   :  { %v1447_v51 = vsub.f32 1.0, %v1415_v42  ;;  %v1258_v52 = vsel %vm1034_vm0, %v906_v39, 1.0  ;;  %vm1066_vm1 = vcmp.gt.f32.partialorder %v1002_v43, 0.0  ;;  %v1130_v54 = vsel %vm1034_vm0, %v2040_v55, 1.0 }
 0x123   :  { %v1098_v57 = vsel %vm1066_vm1, %v2042_v56, 1.0  ;;  %v1290_v53 = vsel %vm1066_vm1, %v1002_v43, 1.0  ;;  %v907_v58 = vadd.f32 %v875_v44, %v843_v34  ;;  %v1003_v59 = vadd.f32 %v971_v45, %v939_v29 }
 0x124   :  { %v1577_v60 = vadd.f32 %v1576_v48, %v1447_v51  ;;  %v1162_v61 = vmul.f32 %v1130_v54, %v1098_v57  ;;  %v1322_v62 = vmul.f32 %v1290_v53, %v1258_v52  ;;  %v940_v63 = vmul.f32 %v2055_v31, %v2055_v31 }
 0x125   :  { %vm1035_vm2 = vcmp.gt.f32.partialorder %v907_v58, 0.0  ;;  %vm1067_vm3 = vcmp.gt.f32.partialorder %v1003_v59, 0.0  ;;  %v876_v0 = vmul.f32 %v406_v35, %v406_v35  ;;  %v972_v1 = vmul.f32 %v727_v36, %v727_v36  ;;  %v2073_v2 = vpop.f32.mrb[24].mxu0  ;;  %v2075_v5 = vpop.f32.mrb[24].mxu1 }
 0x126   :  { %v1763_v55 = vpop.eup %1762  ;;  %v1226_v6 = vadd.f32 %v1194_v33, %v1162_v61  ;;  %1766 = vrsqrt.f32 %v1322_v62  ;;  %v1259_v56 = vsel %vm1035_vm2, %v907_v58, 1.0  ;;  %v1099_v7 = vsel %vm1067_vm3, %v2048_v4, 1.0  ;;  %v2078_v8 = vpop.f32.mrb[25].mxu0 }
 0x127   :  { %v737_v9 = vpop.f32.mrb[25].mxu1  ;;  %v1416_v10 = vmul.f32 %v1763_v55, %v1224_v23  ;;  %v1131_v11 = vsel %vm1035_vm2, %v2046_v3, 1.0  ;;  %v1291_v12 = vsel %vm1067_vm3, %v1003_v59, 1.0  ;;  %v908_v13 = vadd.f32 %v876_v0, %v844_v50  ;;  %v2081_v14 = vpop.f32.mrb[26].mxu0 }
 0x128   :  { %v2083_v15 = vpop.f32.mrb[26].mxu1  ;;  %v1163_v16 = vmul.f32 %v1131_v11, %v1099_v7  ;;  %v1323_v17 = vmul.f32 %v1291_v12, %v1259_v56  ;;  %v1004_v20 = vadd.f32 %v972_v1, %v940_v63  ;;  %v1196_v21 = vmul.f32 %v727_v36, %v406_v35  ;;  %v2085_v22 = vpop.f32.mrb[27].mxu0 }
 0x129   :  { %v2087_v18 = vpop.f32.mrb[27].mxu1  ;;  %v1765_v4 = vpop.eup %1764  ;;  %v1448_v24 = vsub.f32 1.0, %v1416_v10  ;;  %vm1036_vm4 = vcmp.gt.f32.partialorder %v908_v13, 0.0  ;;  %v845_v3 = vmul.f32 %v2061_v40, %v2061_v40  ;;  %v941_v23 = vmul.f32 %v2063_v41, %v2063_v41 }
 0x12a   :  { %v1417_v25 = vmul.f32 %v1765_v4, %v1225_v37  ;;  %v1227_v19 = vadd.f32 %v1195_v49, %v1163_v16  ;;  %1768 = vrsqrt.f32 %v1323_v17  ;;  %v1260_v26 = vsel %vm1036_vm4, %v908_v13, 1.0 }
 0x12b   :  { %v1578_v27 = vadd.f32 %v1577_v60, %v1448_v24  ;;  %vm1068_vm5 = vcmp.gt.f32.partialorder %v1004_v20, 0.0  ;;  %v1132_v32 = vsel %vm1036_vm4, %v2053_v28, 1.0  ;;  %v877_v33 = vmul.f32 %v2065_v46, %v2065_v46 }
 0x12c   :  { %v1449_v34 = vsub.f32 1.0, %v1417_v25  ;;  %v1100_v29 = vsel %vm1068_vm5, %v2055_v31, 1.0  ;;  %v1292_v35 = vsel %vm1068_vm5, %v1004_v20, 1.0  ;;  %v973_v36 = vmul.f32 %v731_v47, %v731_v47 }
 0x12d   :  { %v1164_v30 = vmul.f32 %v1132_v32, %v1100_v29  ;;  %v1324_v38 = vmul.f32 %v1292_v35, %v1260_v26  ;;  %v909_v39 = vadd.f32 %v877_v33, %v845_v3  ;;  %v1197_v37 = vmul.f32 %v731_v47, %v2065_v46  ;;  %v2098_v42 = vpop.f32.mrb[28].mxu0  ;;  %v2100_v43 = vpop.f32.mrb[28].mxu1 }
 0x12e   :  { %v1579_v44 = vadd.f32 %v1578_v27, %v1449_v34  ;;  %v1005_v45 = vadd.f32 %v973_v36, %v941_v23  ;;  %v846_v28 = vmul.f32 %v2073_v2, %v2073_v2  ;;  %v942_v48 = vmul.f32 %v2075_v5, %v2075_v5  ;;  %v2106_v31 = vpop.f32.mrb[29].mxu0  ;;  %v2108_v49 = vpop.f32.mrb[29].mxu1 }
 0x12f   :  { %v1228_v50 = vadd.f32 %v1196_v21, %v1164_v30  ;;  %1770 = vrsqrt.f32 %v1324_v38  ;;  %vm1037_vm6 = vcmp.gt.f32.partialorder %v909_v39, 0.0  ;;  %v878_v46 = vmul.f32 %v2078_v8, %v2078_v8  ;;  %v2112_v47 = vpop.f32.mrb[30].mxu0  ;;  %v2114_v51 = vpop.f32.mrb[30].mxu1 }
 0x130   :  { %v1767_v52 = vpop.eup %1766  ;;  %v1261_v54 = vsel %vm1037_vm6, %v909_v39, 1.0  ;;  %vm1069_vm7 = vcmp.gt.f32.partialorder %v1005_v45, 0.0  ;;  %v1133_v57 = vsel %vm1037_vm6, %v2061_v40, 1.0  ;;  %v974_v53 = vmul.f32 %v737_v9, %v737_v9  ;;  %v2117_v58 = vpop.f32.mrb[31].mxu0 }
 0x131   :  { %v2119_v59 = vpop.f32.mrb[31].mxu1  ;;  %v1418_v60 = vmul.f32 %v1767_v52, %v1226_v6  ;;  %v1101_v61 = vsel %vm1069_vm7, %v2063_v41, 1.0  ;;  %v1293_v62 = vsel %vm1069_vm7, %v1005_v45, 1.0  ;;  %v910_v63 = vadd.f32 %v878_v46, %v846_v28 }
 0x132   :  { %v1165_v0 = vmul.f32 %v1133_v57, %v1101_v61  ;;  %v1325_v1 = vmul.f32 %v1293_v62, %v1261_v54  ;;  %v1006_v55 = vadd.f32 %v974_v53, %v942_v48  ;;  %v1198_v56 = vmul.f32 %v737_v9, %v2078_v8 }
 0x133   :  { %v1450_v7 = vsub.f32 1.0, %v1418_v60  ;;  %vm1038_vm8 = vcmp.gt.f32.partialorder %v910_v63, 0.0  ;;  %v847_v40 = vmul.f32 %v2081_v14, %v2081_v14  ;;  %v943_v10 = vmul.f32 %v2083_v15, %v2083_v15 }
 0x134   :  { %v1769_v11 = vpop.eup %1768  ;;  %v1229_v12 = vadd.f32 %v1197_v37, %v1165_v0  ;;  %1772 = vrsqrt.f32 %v1325_v1  ;;  %v1262_v6 = vsel %vm1038_vm8, %v910_v63, 1.0  ;;  %vm1070_vm9 = vcmp.gt.f32.partialorder %v1006_v55, 0.0 }
 0x135   :  { %v1580_v41 = vadd.f32 %v1579_v44, %v1450_v7  ;;  %v1419_v13 = vmul.f32 %v1769_v11, %v1227_v19  ;;  %v1102_v16 = vsel %vm1070_vm9, %v2075_v5, 1.0  ;;  %v1134_v17 = vsel %vm1038_vm8, %v2073_v2, 1.0  ;;  %v2129_v8 = vpop.f32.mrb[32].mxu0  ;;  %v2131_v9 = vpop.f32.mrb[32].mxu1 }
 0x136   :  { %v1166_v20 = vmul.f32 %v1134_v17, %v1102_v16  ;;  %v1294_v21 = vsel %vm1070_vm9, %v1006_v55, 1.0  ;;  %v879_v4 = vmul.f32 %v2085_v22, %v2085_v22  ;;  %v975_v24 = vmul.f32 %v2087_v18, %v2087_v18  ;;  %v2137_v3 = vpop.f32.mrb[33].mxu0  ;;  %v2139_v23 = vpop.f32.mrb[33].mxu1 }
 0x137   :  { %v1451_v25 = vsub.f32 1.0, %v1419_v13  ;;  %v1326_v5 = vmul.f32 %v1294_v21, %v1262_v6  ;;  %v1199_v2 = vmul.f32 %v2087_v18, %v2085_v22  ;;  %v848_v19 = vmul.f32 %v2098_v42, %v2098_v42  ;;  %v2145_v26 = vpop.f32.mrb[34].mxu0  ;;  %v2147_v27 = vpop.f32.mrb[34].mxu1 }
 0x138   :  { %v1230_v32 = vadd.f32 %v1198_v56, %v1166_v20  ;;  %v911_v33 = vadd.f32 %v879_v4, %v847_v40  ;;  %v1007_v34 = vadd.f32 %v975_v24, %v943_v10  ;;  %v944_v29 = vmul.f32 %v2100_v43, %v2100_v43  ;;  %v2151_v35 = vpop.f32.mrb[35].mxu0  ;;  %v2153_v36 = vpop.f32.mrb[35].mxu1 }
 0x139   :  { %v1771_v30 = vpop.eup %1770  ;;  %v1581_v38 = vadd.f32 %v1580_v41, %v1451_v25  ;;  %1774 = vrsqrt.f32 %v1326_v5  ;;  %v880_v22 = vmul.f32 %v2106_v31, %v2106_v31  ;;  %v976_v18 = vmul.f32 %v2108_v49, %v2108_v49 }
 0x13a   :  { %v1420_v39 = vmul.f32 %v1771_v30, %v1228_v50  ;;  %vm1039_vm10 = vcmp.gt.f32.partialorder %v911_v33, 0.0  ;;  %vm1071_vm11 = vcmp.gt.f32.partialorder %v1007_v34, 0.0  ;;  %v1200_v37 = vmul.f32 %v2108_v49, %v2106_v31 }
 0x13b   :  { %v1263_v44 = vsel %vm1039_vm10, %v911_v33, 1.0  ;;  %v1103_v45 = vsel %vm1071_vm11, %v2083_v15, 1.0  ;;  %v1135_v28 = vsel %vm1039_vm10, %v2081_v14, 1.0  ;;  %v1295_v48 = vsel %vm1071_vm11, %v1007_v34, 1.0 }
 0x13c   :  { %v1452_v46 = vsub.f32 1.0, %v1420_v39  ;;  %v1167_v52 = vmul.f32 %v1135_v28, %v1103_v45  ;;  %v1327_v54 = vmul.f32 %v1295_v48, %v1263_v44  ;;  %v912_v57 = vadd.f32 %v880_v22, %v848_v19 }
 0x13d   :  { %v1008_v53 = vadd.f32 %v976_v18, %v944_v29  ;;  %v849_v60 = vmul.f32 %v2112_v47, %v2112_v47  ;;  %v945_v50 = vmul.f32 %v2114_v51, %v2114_v51  ;;  %v881_v31 = vmul.f32 %v2117_v58, %v2117_v58  ;;  %v2169_v49 = vpop.f32.mrb[36].mxu0  ;;  %v2171_v15 = vpop.f32.mrb[36].mxu1 }
 0x13e   :  { %v1773_v14 = vpop.eup %1772  ;;  %v1582_v61 = vadd.f32 %v1581_v38, %v1452_v46  ;;  %v1231_v62 = vadd.f32 %v1199_v2, %v1167_v52  ;;  %1776 = vrsqrt.f32 %v1327_v54  ;;  %vm1040_vm12 = vcmp.gt.f32.partialorder %v912_v57, 0.0  ;;  %v2173_v63 = vpop.f32.mrb[37].mxu0 }
 0x13f   :  { %v2175_v0 = vpop.f32.mrb[37].mxu1  ;;  %v1421_v1 = vmul.f32 %v1773_v14, %v1229_v12  ;;  %v1264_v55 = vsel %vm1040_vm12, %v912_v57, 1.0  ;;  %vm1072_vm13 = vcmp.gt.f32.partialorder %v1008_v53, 0.0  ;;  %v1136_v56 = vsel %vm1040_vm12, %v2098_v42, 1.0  ;;  %v2178_v7 = vpop.f32.mrb[38].mxu0 }
 0x140   :  { %v2180_v40 = vpop.f32.mrb[38].mxu1  ;;  %v1104_v10 = vsel %vm1072_vm13, %v2100_v43, 1.0  ;;  %v1296_v11 = vsel %vm1072_vm13, %v1008_v53, 1.0  ;;  %v913_v6 = vadd.f32 %v881_v31, %v849_v60  ;;  %v977_v41 = vmul.f32 %v2119_v59, %v2119_v59  ;;  %v2185_v13 = vpop.f32.mrb[39].mxu0 }
 0x141   :  { %v2187_v16 = vpop.f32.mrb[39].mxu1  ;;  %v1453_v12 = vsub.f32 1.0, %v1421_v1  ;;  %v1168_v17 = vmul.f32 %v1136_v56, %v1104_v10  ;;  %v1328_v20 = vmul.f32 %v1296_v11, %v1264_v55  ;;  %v1201_v42 = vmul.f32 %v2119_v59, %v2117_v58 }
 0x142   :  { %vm1041_vm14 = vcmp.gt.f32.partialorder %v913_v6, 0.0  ;;  %v1009_v21 = vadd.f32 %v977_v41, %v945_v50  ;;  %v850_v43 = vmul.f32 %v2129_v8, %v2129_v8  ;;  %v946_v4 = vmul.f32 %v2131_v9, %v2131_v9 }
 0x143   :  { %v1775_v24 = vpop.eup %1774  ;;  %v1583_v25 = vadd.f32 %v1582_v61, %v1453_v12  ;;  %v1232_v5 = vadd.f32 %v1200_v37, %v1168_v17  ;;  %1778 = vrsqrt.f32 %v1328_v20  ;;  %v1265_v2 = vsel %vm1041_vm14, %v913_v6, 1.0 }
 0x144   :  { %v1422_v19 = vmul.f32 %v1775_v24, %v1230_v32  ;;  %vm1073_vm15 = vcmp.gt.f32.partialorder %v1009_v21, 0.0  ;;  %v1137_v33 = vsel %vm1041_vm14, %v2112_v47, 1.0  ;;  %v882_v58 = vmul.f32 %v2137_v3, %v2137_v3 }
 0x145   :  { %v1105_v59 = vsel %vm1073_vm15, %v2114_v51, 1.0  ;;  %v1297_v34 = vsel %vm1073_vm15, %v1009_v21, 1.0  ;;  %v978_v29 = vmul.f32 %v2139_v23, %v2139_v23  ;;  %v1202_v30 = vmul.f32 %v2139_v23, %v2137_v3  ;;  %v2203_v38 = vpop.f32.mrb[40].mxu0  ;;  %v2205_v22 = vpop.f32.mrb[40].mxu1 }
 0x146   :  { %v1454_v32 = vsub.f32 1.0, %v1422_v19  ;;  %v1169_v18 = vmul.f32 %v1137_v33, %v1105_v59  ;;  %v1329_v39 = vmul.f32 %v1297_v34, %v1265_v2  ;;  %v914_v47 = vadd.f32 %v882_v58, %v850_v43  ;;  %v2207_v37 = vpop.f32.mrb[41].mxu0  ;;  %v2209_v44 = vpop.f32.mrb[41].mxu1 }
 0x147   :  { %v1010_v51 = vadd.f32 %v978_v29, %v946_v4  ;;  %v851_v45 = vmul.f32 %v2145_v26, %v2145_v26  ;;  %v947_v28 = vmul.f32 %v2147_v27, %v2147_v27  ;;  %v883_v3 = vmul.f32 %v2151_v35, %v2151_v35  ;;  %v2217_v23 = vpop.f32.mrb[42].mxu0  ;;  %v2219_v48 = vpop.f32.mrb[42].mxu1 }
 0x148   :  { %v1777_v46 = vpop.eup %1776  ;;  %v1584_v52 = vadd.f32 %v1583_v25, %v1454_v32  ;;  %v1233_v54 = vadd.f32 %v1201_v42, %v1169_v18  ;;  %1780 = vrsqrt.f32 %v1329_v39  ;;  %vm1042_vm0 = vcmp.gt.f32.partialorder %v914_v47, 0.0  ;;  %v2221_v57 = vpop.f32.mrb[43].mxu0 }
 0x149   :  { %v2223_v53 = vpop.f32.mrb[43].mxu1  ;;  %v1423_v60 = vmul.f32 %v1777_v46, %v1231_v62  ;;  %v1266_v50 = vsel %vm1042_vm0, %v914_v47, 1.0  ;;  %vm1074_vm1 = vcmp.gt.f32.partialorder %v1010_v51, 0.0  ;;  %v1138_v31 = vsel %vm1042_vm0, %v2129_v8, 1.0 }
 0x14a   :  { %v1106_v14 = vsel %vm1074_vm1, %v2131_v9, 1.0  ;;  %v1298_v61 = vsel %vm1074_vm1, %v1010_v51, 1.0  ;;  %v915_v1 = vadd.f32 %v883_v3, %v851_v45  ;;  %v979_v55 = vmul.f32 %v2153_v36, %v2153_v36 }
 0x14b   :  { %v1455_v56 = vsub.f32 1.0, %v1423_v60  ;;  %v1170_v10 = vmul.f32 %v1138_v31, %v1106_v14  ;;  %v1330_v11 = vmul.f32 %v1298_v61, %v1266_v50  ;;  %v1203_v6 = vmul.f32 %v2153_v36, %v2151_v35 }
 0x14c   :  { %vm1043_vm2 = vcmp.gt.f32.partialorder %v915_v1, 0.0  ;;  %v1011_v41 = vadd.f32 %v979_v55, %v947_v28  ;;  %v852_v62 = vmul.f32 %v2169_v49, %v2169_v49  ;;  %v948_v8 = vmul.f32 %v2171_v15, %v2171_v15 }
 0x14d   :  { %v1779_v9 = vpop.eup %1778  ;;  %v1585_v12 = vadd.f32 %v1584_v52, %v1455_v56  ;;  %v1234_v17 = vadd.f32 %v1202_v30, %v1170_v10  ;;  %1782 = vrsqrt.f32 %v1330_v11  ;;  %v1267_v20 = vsel %vm1043_vm2, %v915_v1, 1.0  ;;  %v2235_v42 = vpop.f32.mrb[44].mxu0 }
 0x14e   :  { %v2237_v21 = vpop.f32.mrb[44].mxu1  ;;  %v1424_v43 = vmul.f32 %v1779_v9, %v1232_v5  ;;  %vm1075_vm3 = vcmp.gt.f32.partialorder %v1011_v41, 0.0  ;;  %v1139_v35 = vsel %vm1043_vm2, %v2145_v26, 1.0  ;;  %v884_v36 = vmul.f32 %v2173_v63, %v2173_v63  ;;  %v2242_v4 = vpop.f32.mrb[45].mxu0 }
 0x14f   :  { %v2244_v24 = vpop.f32.mrb[45].mxu1  ;;  %v1107_v25 = vsel %vm1075_vm3, %v2147_v27, 1.0  ;;  %v1299_v2 = vsel %vm1075_vm3, %v1011_v41, 1.0  ;;  %v980_v19 = vmul.f32 %v2175_v0, %v2175_v0  ;;  %v1204_v33 = vmul.f32 %v2175_v0, %v2173_v63  ;;  %v2251_v5 = vpop.f32.mrb[46].mxu0 }
 0x150   :  { %v2253_v58 = vpop.f32.mrb[46].mxu1  ;;  %v1456_v26 = vsub.f32 1.0, %v1424_v43  ;;  %v1171_v59 = vmul.f32 %v1139_v35, %v1107_v25  ;;  %v1331_v34 = vmul.f32 %v1299_v2, %v1267_v20  ;;  %v916_v29 = vadd.f32 %v884_v36, %v852_v62  ;;  %v2255_v30 = vpop.f32.mrb[47].mxu0 }
 0x151   :  { %v2257_v32 = vpop.f32.mrb[47].mxu1  ;;  %v1012_v27 = vadd.f32 %v980_v19, %v948_v8  ;;  %v853_v18 = vmul.f32 %v2178_v7, %v2178_v7  ;;  %v949_v39 = vmul.f32 %v2180_v40, %v2180_v40  ;;  %v885_v63 = vmul.f32 %v2185_v13, %v2185_v13 }
 0x152   :  { %v1781_v0 = vpop.eup %1780  ;;  %v1586_v47 = vadd.f32 %v1585_v12, %v1456_v26  ;;  %v1235_v51 = vadd.f32 %v1203_v6, %v1171_v59  ;;  %1784 = vrsqrt.f32 %v1331_v34  ;;  %vm1044_vm4 = vcmp.gt.f32.partialorder %v916_v29, 0.0 }
 0x153   :  { %v1425_v45 = vmul.f32 %v1781_v0, %v1233_v54  ;;  %v1268_v28 = vsel %vm1044_vm4, %v916_v29, 1.0  ;;  %vm1076_vm5 = vcmp.gt.f32.partialorder %v1012_v27, 0.0  ;;  %v1140_v3 = vsel %vm1044_vm4, %v2169_v49, 1.0 }
 0x154   :  { %v1108_v46 = vsel %vm1076_vm5, %v2171_v15, 1.0  ;;  %v1300_v52 = vsel %vm1076_vm5, %v1012_v27, 1.0  ;;  %v917_v60 = vadd.f32 %v885_v63, %v853_v18  ;;  %v981_v50 = vmul.f32 %v2187_v16, %v2187_v16 }
 0x155   :  { %v1457_v31 = vsub.f32 1.0, %v1425_v45  ;;  %v1172_v14 = vmul.f32 %v1140_v3, %v1108_v46  ;;  %v1332_v61 = vmul.f32 %v1300_v52, %v1268_v28  ;;  %v1205_v1 = vmul.f32 %v2187_v16, %v2185_v13  ;;  %v2271_v55 = vpop.f32.mrb[48].mxu0  ;;  %v2273_v54 = vpop.f32.mrb[48].mxu1 }
 0x156   :  { %vm1045_vm6 = vcmp.gt.f32.partialorder %v917_v60, 0.0  ;;  %v1013_v56 = vadd.f32 %v981_v50, %v949_v39  ;;  %v854_v49 = vmul.f32 %v2203_v38, %v2203_v38  ;;  %v950_v15 = vmul.f32 %v2205_v22, %v2205_v22  ;;  %v2279_v10 = vpop.f32.mrb[49].mxu0  ;;  %v2281_v11 = vpop.f32.mrb[49].mxu1 }
 0x157   :  { %v1783_v6 = vpop.eup %1782  ;;  %v1587_v41 = vadd.f32 %v1586_v47, %v1457_v31  ;;  %v1236_v62 = vadd.f32 %v1204_v33, %v1172_v14  ;;  %1786 = vrsqrt.f32 %v1332_v61  ;;  %v1269_v13 = vsel %vm1045_vm6, %v917_v60, 1.0  ;;  %v2283_v16 = vpop.f32.mrb[50].mxu0 }
 0x158   :  { %v2285_v8 = vpop.f32.mrb[50].mxu1  ;;  %v1426_v9 = vmul.f32 %v1783_v6, %v1234_v17  ;;  %vm1077_vm7 = vcmp.gt.f32.partialorder %v1013_v56, 0.0  ;;  %v1141_v12 = vsel %vm1045_vm6, %v2178_v7, 1.0  ;;  %v886_v20 = vmul.f32 %v2207_v37, %v2207_v37  ;;  %v2290_v43 = vpop.f32.mrb[51].mxu0 }
 0x159   :  { %v2292_v35 = vpop.f32.mrb[51].mxu1  ;;  %v1109_v36 = vsel %vm1077_vm7, %v2180_v40, 1.0  ;;  %v1301_v25 = vsel %vm1077_vm7, %v1013_v56, 1.0  ;;  %v982_v2 = vmul.f32 %v2209_v44, %v2209_v44  ;;  %v1206_v19 = vmul.f32 %v2209_v44, %v2207_v37 }
 0x15a   :  { %v1458_v17 = vsub.f32 1.0, %v1426_v9  ;;  %v1173_v33 = vmul.f32 %v1141_v12, %v1109_v36  ;;  %v1333_v26 = vmul.f32 %v1301_v25, %v1269_v13  ;;  %v918_v7 = vadd.f32 %v886_v20, %v854_v49 }
 0x15b   :  { %v1014_v59 = vadd.f32 %v982_v2, %v950_v15  ;;  %v855_v34 = vmul.f32 %v2217_v23, %v2217_v23  ;;  %v951_v29 = vmul.f32 %v2219_v48, %v2219_v48  ;;  %v887_v40 = vmul.f32 %v2221_v57, %v2221_v57 }
 0x15c   :  { %v1785_v27 = vpop.eup %1784  ;;  %v1588_v18 = vadd.f32 %v1587_v41, %v1458_v17  ;;  %v1237_v39 = vadd.f32 %v1205_v1, %v1173_v33  ;;  %1788 = vrsqrt.f32 %v1333_v26  ;;  %vm1046_vm8 = vcmp.gt.f32.partialorder %v918_v7, 0.0 }
 0x15d   :  { %v1427_v37 = vmul.f32 %v1785_v27, %v1235_v51  ;;  %v1270_v44 = vsel %vm1046_vm8, %v918_v7, 1.0  ;;  %vm1078_vm9 = vcmp.gt.f32.partialorder %v1014_v59, 0.0  ;;  %v1142_v63 = vsel %vm1046_vm8, %v2203_v38, 1.0  ;;  %v2306_v0 = vpop.f32.mrb[52].mxu0  ;;  %v2308_v47 = vpop.f32.mrb[52].mxu1 }
 0x15e   :  { %v1110_v45 = vsel %vm1078_vm9, %v2205_v22, 1.0  ;;  %v1302_v28 = vsel %vm1078_vm9, %v1014_v59, 1.0  ;;  %v919_v3 = vadd.f32 %v887_v40, %v855_v34  ;;  %v983_v46 = vmul.f32 %v2223_v53, %v2223_v53  ;;  %v2313_v52 = vpop.f32.mrb[53].mxu0  ;;  %v2315_v60 = vpop.f32.mrb[53].mxu1 }
 0x15f   :  { %v1459_v51 = vsub.f32 1.0, %v1427_v37  ;;  %v1174_v50 = vmul.f32 %v1142_v63, %v1110_v45  ;;  %v1334_v31 = vmul.f32 %v1302_v28, %v1270_v44  ;;  %v1207_v38 = vmul.f32 %v2223_v53, %v2221_v57  ;;  %v2319_v14 = vpop.f32.mrb[54].mxu0  ;;  %v2321_v61 = vpop.f32.mrb[54].mxu1 }
 0x160   :  { %vm1047_vm10 = vcmp.gt.f32.partialorder %v919_v3, 0.0  ;;  %v1015_v22 = vadd.f32 %v983_v46, %v951_v29  ;;  %v856_v1 = vmul.f32 %v2235_v42, %v2235_v42  ;;  %v952_v56 = vmul.f32 %v2237_v21, %v2237_v21  ;;  %v2327_v49 = vpop.f32.mrb[55].mxu0  ;;  %v2329_v15 = vpop.f32.mrb[55].mxu1 }
 0x161   :  { %v1787_v6 = vpop.eup %1786  ;;  %v1589_v41 = vadd.f32 %v1588_v18, %v1459_v51  ;;  %v1238_v13 = vadd.f32 %v1206_v19, %v1174_v50  ;;  %1790 = vrsqrt.f32 %v1334_v31  ;;  %v1271_v57 = vsel %vm1047_vm10, %v919_v3, 1.0 }
 0x162   :  { %v1428_v53 = vmul.f32 %v1787_v6, %v1236_v62  ;;  %vm1079_vm11 = vcmp.gt.f32.partialorder %v1015_v22, 0.0  ;;  %v1143_v9 = vsel %vm1047_vm10, %v2217_v23, 1.0  ;;  %v888_v12 = vmul.f32 %v2242_v4, %v2242_v4 }
 0x163   :  { %v1111_v20 = vsel %vm1079_vm11, %v2219_v48, 1.0  ;;  %v1303_v36 = vsel %vm1079_vm11, %v1015_v22, 1.0  ;;  %v984_v25 = vmul.f32 %v2244_v24, %v2244_v24  ;;  %v1208_v2 = vmul.f32 %v2244_v24, %v2242_v4 }
 0x164   :  { %v1460_v17 = vsub.f32 1.0, %v1428_v53  ;;  %v1175_v19 = vmul.f32 %v1143_v9, %v1111_v20  ;;  %v1335_v33 = vmul.f32 %v1303_v36, %v1271_v57  ;;  %v920_v26 = vadd.f32 %v888_v12, %v856_v1 }
 0x165   :  { %v1016_v62 = vadd.f32 %v984_v25, %v952_v56  ;;  %v857_v23 = vmul.f32 %v2251_v5, %v2251_v5  ;;  %v953_v7 = vmul.f32 %v2253_v58, %v2253_v58  ;;  %v889_v48 = vmul.f32 %v2255_v30, %v2255_v30  ;;  %v2345_v59 = vpop.f32.mrb[56].mxu0  ;;  %v2347_v34 = vpop.f32.mrb[56].mxu1 }
 0x166   :  { %v1789_v29 = vpop.eup %1788  ;;  %v1590_v4 = vadd.f32 %v1589_v41, %v1460_v17  ;;  %v1239_v24 = vadd.f32 %v1207_v38, %v1175_v19  ;;  %1792 = vrsqrt.f32 %v1335_v33  ;;  %vm1048_vm12 = vcmp.gt.f32.partialorder %v920_v26, 0.0  ;;  %v2349_v40 = vpop.f32.mrb[57].mxu0 }
 0x167   :  { %v2351_v27 = vpop.f32.mrb[57].mxu1  ;;  %v1429_v18 = vmul.f32 %v1789_v29, %v1237_v39  ;;  %v1272_v37 = vsel %vm1048_vm12, %v920_v26, 1.0  ;;  %vm1080_vm13 = vcmp.gt.f32.partialorder %v1016_v62, 0.0  ;;  %v1144_v44 = vsel %vm1048_vm12, %v2235_v42, 1.0  ;;  %v2354_v63 = vpop.f32.mrb[58].mxu0 }
 0x168   :  { %v2356_v45 = vpop.f32.mrb[58].mxu1  ;;  %v1112_v28 = vsel %vm1080_vm13, %v2237_v21, 1.0  ;;  %v1304_v3 = vsel %vm1080_vm13, %v1016_v62, 1.0  ;;  %v921_v46 = vadd.f32 %v889_v48, %v857_v23  ;;  %v985_v51 = vmul.f32 %v2257_v32, %v2257_v32  ;;  %v2361_v50 = vpop.f32.mrb[59].mxu0 }
 0x169   :  { %v2363_v31 = vpop.f32.mrb[59].mxu1  ;;  %v1461_v39 = vsub.f32 1.0, %v1429_v18  ;;  %v1176_v38 = vmul.f32 %v1144_v44, %v1112_v28  ;;  %v1336_v22 = vmul.f32 %v1304_v3, %v1272_v37  ;;  %v1209_v42 = vmul.f32 %v2257_v32, %v2255_v30 }
 0x16a   :  { %vm1049_vm14 = vcmp.gt.f32.partialorder %v921_v46, 0.0  ;;  %v1017_v1 = vadd.f32 %v985_v51, %v953_v7  ;;  %v858_v21 = vmul.f32 %v2271_v55, %v2271_v55  ;;  %v954_v56 = vmul.f32 %v2273_v54, %v2273_v54 }
 0x16b   :  { %v1791_v6 = vpop.eup %1790  ;;  %v1591_v41 = vadd.f32 %v1590_v4, %v1461_v39  ;;  %v1240_v57 = vadd.f32 %v1208_v2, %v1176_v38  ;;  %1794 = vrsqrt.f32 %v1336_v22  ;;  %v1273_v53 = vsel %vm1049_vm14, %v921_v46, 1.0 }
 0x16c   :  { %v1430_v9 = vmul.f32 %v1791_v6, %v1238_v13  ;;  %vm1081_vm15 = vcmp.gt.f32.partialorder %v1017_v1, 0.0  ;;  %v1145_v12 = vsel %vm1049_vm14, %v2251_v5, 1.0  ;;  %v890_v30 = vmul.f32 %v2279_v10, %v2279_v10 }
 0x16d   :  { %v1113_v32 = vsel %vm1081_vm15, %v2253_v58, 1.0  ;;  %v1305_v20 = vsel %vm1081_vm15, %v1017_v1, 1.0  ;;  %v986_v36 = vmul.f32 %v2281_v11, %v2281_v11  ;;  %v1210_v25 = vmul.f32 %v2281_v11, %v2279_v10  ;;  %v2379_v17 = vpop.f32.mrb[60].mxu0  ;;  %v2381_v2 = vpop.f32.mrb[60].mxu1 }
 0x16e   :  { %v1462_v13 = vsub.f32 1.0, %v1430_v9  ;;  %v1177_v19 = vmul.f32 %v1145_v12, %v1113_v32  ;;  %v1337_v33 = vmul.f32 %v1305_v20, %v1273_v53  ;;  %v922_v5 = vadd.f32 %v890_v30, %v858_v21  ;;  %v2383_v26 = vpop.f32.mrb[61].mxu0  ;;  %v2385_v62 = vpop.f32.mrb[61].mxu1 }
 0x16f   :  { %v1018_v58 = vadd.f32 %v986_v36, %v954_v56  ;;  %v859_v23 = vmul.f32 %v2283_v16, %v2283_v16  ;;  %v955_v7 = vmul.f32 %v2285_v8, %v2285_v8  ;;  %v891_v10 = vmul.f32 %v2290_v43, %v2290_v43  ;;  %v2393_v11 = vpop.f32.mrb[62].mxu0  ;;  %v2395_v48 = vpop.f32.mrb[62].mxu1 }
 0x170   :  { %v1793_v29 = vpop.eup %1792  ;;  %v1592_v4 = vadd.f32 %v1591_v41, %v1462_v13  ;;  %v1241_v18 = vadd.f32 %v1209_v42, %v1177_v19  ;;  %1796 = vrsqrt.f32 %v1337_v33  ;;  %vm1050_vm0 = vcmp.gt.f32.partialorder %v922_v5, 0.0  ;;  %v2397_v37 = vpop.f32.mrb[63].mxu0 }
 0x171   :  { %v2399_v44 = vpop.f32.mrb[63].mxu1  ;;  %v1431_v28 = vmul.f32 %v1793_v29, %v1239_v24  ;;  %v1274_v3 = vsel %vm1050_vm0, %v922_v5, 1.0  ;;  %vm1082_vm1 = vcmp.gt.f32.partialorder %v1018_v58, 0.0  ;;  %v1146_v46 = vsel %vm1050_vm0, %v2271_v55, 1.0 }
 0x172   :  { %v1114_v51 = vsel %vm1082_vm1, %v2273_v54, 1.0  ;;  %v1306_v39 = vsel %vm1082_vm1, %v1018_v58, 1.0  ;;  %v923_v38 = vadd.f32 %v891_v10, %v859_v23  ;;  %v987_v22 = vmul.f32 %v2292_v35, %v2292_v35 }
 0x173   :  { %v1463_v1 = vsub.f32 1.0, %v1431_v28  ;;  %v1178_v42 = vmul.f32 %v1146_v46, %v1114_v51  ;;  %v1338_v21 = vmul.f32 %v1306_v39, %v1274_v3  ;;  %v1211_v56 = vmul.f32 %v2292_v35, %v2290_v43 }
 0x174   :  { %vm1051_vm2 = vcmp.gt.f32.partialorder %v923_v38, 0.0  ;;  %v1019_v6 = vadd.f32 %v987_v22, %v955_v7  ;;  %v860_v24 = vmul.f32 %v2306_v0, %v2306_v0  ;;  %v956_v55 = vmul.f32 %v2308_v47, %v2308_v47 }
 0x175   :  { %v1795_v54 = vpop.eup %1794  ;;  %v1593_v41 = vadd.f32 %v1592_v4, %v1463_v1  ;;  %v1242_v53 = vadd.f32 %v1210_v25, %v1178_v42  ;;  %1798 = vrsqrt.f32 %v1338_v21  ;;  %v1275_v9 = vsel %vm1051_vm2, %v923_v38, 1.0 }
 0x176   :  { %v1432_v12 = vmul.f32 %v1795_v54, %v1240_v57  ;;  %vm1083_vm3 = vcmp.gt.f32.partialorder %v1019_v6, 0.0  ;;  %v1147_v30 = vsel %vm1051_vm2, %v2283_v16, 1.0  ;;  %v892_v43 = vmul.f32 %v2313_v52, %v2313_v52 }
 0x177   :  { %v1115_v35 = vsel %vm1083_vm3, %v2285_v8, 1.0  ;;  %v1307_v32 = vsel %vm1083_vm3, %v1019_v6, 1.0  ;;  %v988_v20 = vmul.f32 %v2315_v60, %v2315_v60  ;;  %v1212_v36 = vmul.f32 %v2315_v60, %v2313_v52 }
 0x178   :  { %v1464_v13 = vsub.f32 1.0, %v1432_v12  ;;  %v1179_v25 = vmul.f32 %v1147_v30, %v1115_v35  ;;  %v1339_v19 = vmul.f32 %v1307_v32, %v1275_v9  ;;  %v924_v33 = vadd.f32 %v892_v43, %v860_v24 }
 0x179   :  { %v1020_v57 = vadd.f32 %v988_v20, %v956_v55  ;;  %v861_v16 = vmul.f32 %v2319_v14, %v2319_v14  ;;  %v957_v5 = vmul.f32 %v2321_v61, %v2321_v61  ;;  %v893_v8 = vmul.f32 %v2327_v49, %v2327_v49 }
 0x17a   :  { %v1797_v58 = vpop.eup %1796  ;;  %v1594_v23 = vadd.f32 %v1593_v41, %v1464_v13  ;;  %v1243_v7 = vadd.f32 %v1211_v56, %v1179_v25  ;;  %1800 = vrsqrt.f32 %v1339_v19  ;;  %vm1052_vm4 = vcmp.gt.f32.partialorder %v924_v33, 0.0 }
 0x17b   :  { %v1433_v52 = vmul.f32 %v1797_v58, %v1241_v18  ;;  %v1276_v60 = vsel %vm1052_vm4, %v924_v33, 1.0  ;;  %vm1084_vm5 = vcmp.gt.f32.partialorder %v1020_v57, 0.0  ;;  %v1148_v10 = vsel %vm1052_vm4, %v2306_v0, 1.0 }
 0x17c   :  { %v1116_v29 = vsel %vm1084_vm5, %v2308_v47, 1.0  ;;  %v1308_v4 = vsel %vm1084_vm5, %v1020_v57, 1.0  ;;  %v925_v28 = vadd.f32 %v893_v8, %v861_v16  ;;  %v989_v3 = vmul.f32 %v2329_v15, %v2329_v15 }
 0x17d   :  { %v1465_v46 = vsub.f32 1.0, %v1433_v52  ;;  %v1180_v51 = vmul.f32 %v1148_v10, %v1116_v29  ;;  %v1340_v39 = vmul.f32 %v1308_v4, %v1276_v60  ;;  %v1213_v38 = vmul.f32 %v2329_v15, %v2327_v49 }
 0x17e   :  { %vm1053_vm6 = vcmp.gt.f32.partialorder %v925_v28, 0.0  ;;  %v1021_v22 = vadd.f32 %v989_v3, %v957_v5  ;;  %v862_v18 = vmul.f32 %v2345_v59, %v2345_v59  ;;  %v958_v0 = vmul.f32 %v2347_v34, %v2347_v34 }
 0x17f   :  { %v1799_v47 = vpop.eup %1798  ;;  %v1595_v1 = vadd.f32 %v1594_v23, %v1465_v46  ;;  %v1244_v42 = vadd.f32 %v1212_v36, %v1180_v51  ;;  %1802 = vrsqrt.f32 %v1340_v39  ;;  %v1277_v21 = vsel %vm1053_vm6, %v925_v28, 1.0 }
 0x180   :  { %v1434_v56 = vmul.f32 %v1799_v47, %v1242_v53  ;;  %vm1085_vm7 = vcmp.gt.f32.partialorder %v1021_v22, 0.0  ;;  %v1149_v6 = vsel %vm1053_vm6, %v2319_v14, 1.0  ;;  %v894_v49 = vmul.f32 %v2349_v40, %v2349_v40 }
 0x181   :  { %v1117_v15 = vsel %vm1085_vm7, %v2321_v61, 1.0  ;;  %v1309_v24 = vsel %vm1085_vm7, %v1021_v22, 1.0  ;;  %v990_v55 = vmul.f32 %v2351_v27, %v2351_v27  ;;  %v1214_v54 = vmul.f32 %v2351_v27, %v2349_v40 }
 0x182   :  { %v1466_v41 = vsub.f32 1.0, %v1434_v56  ;;  %v1181_v9 = vmul.f32 %v1149_v6, %v1117_v15  ;;  %v1341_v12 = vmul.f32 %v1309_v24, %v1277_v21  ;;  %v926_v30 = vadd.f32 %v894_v49, %v862_v18 }
 0x183   :  { %v1022_v53 = vadd.f32 %v990_v55, %v958_v0  ;;  %v863_v14 = vmul.f32 %v2354_v63, %v2354_v63  ;;  %v959_v43 = vmul.f32 %v2356_v45, %v2356_v45  ;;  %v895_v61 = vmul.f32 %v2361_v50, %v2361_v50 }
 0x184   :  { %v1801_v35 = vpop.eup %1800  ;;  %v1596_v32 = vadd.f32 %v1595_v1, %v1466_v41  ;;  %v1245_v20 = vadd.f32 %v1213_v38, %v1181_v9  ;;  %1804 = vrsqrt.f32 %v1341_v12  ;;  %vm1054_vm8 = vcmp.gt.f32.partialorder %v926_v30, 0.0 }
 0x185   :  { %v1435_v40 = vmul.f32 %v1801_v35, %v1243_v7  ;;  %v1278_v27 = vsel %vm1054_vm8, %v926_v30, 1.0  ;;  %vm1086_vm9 = vcmp.gt.f32.partialorder %v1022_v53, 0.0  ;;  %v1150_v36 = vsel %vm1054_vm8, %v2345_v59, 1.0 }
 0x186   :  { %v1118_v13 = vsel %vm1086_vm9, %v2347_v34, 1.0  ;;  %v1310_v25 = vsel %vm1086_vm9, %v1022_v53, 1.0  ;;  %v927_v19 = vadd.f32 %v895_v61, %v863_v14  ;;  %v991_v33 = vmul.f32 %v2363_v31, %v2363_v31 }
 0x187   :  { %v1467_v57 = vsub.f32 1.0, %v1435_v40  ;;  %v1182_v16 = vmul.f32 %v1150_v36, %v1118_v13  ;;  %v1342_v5 = vmul.f32 %v1310_v25, %v1278_v27  ;;  %v1215_v8 = vmul.f32 %v2363_v31, %v2361_v50 }
 0x188   :  { %vm1055_vm10 = vcmp.gt.f32.partialorder %v927_v19, 0.0  ;;  %v1023_v58 = vadd.f32 %v991_v33, %v959_v43  ;;  %v864_v23 = vmul.f32 %v2379_v17, %v2379_v17  ;;  %v960_v59 = vmul.f32 %v2381_v2, %v2381_v2 }
 0x189   :  { %v1803_v34 = vpop.eup %1802  ;;  %v1597_v7 = vadd.f32 %v1596_v32, %v1467_v57  ;;  %v1246_v52 = vadd.f32 %v1214_v54, %v1182_v16  ;;  %1806 = vrsqrt.f32 %v1342_v5  ;;  %v1279_v60 = vsel %vm1055_vm10, %v927_v19, 1.0 }
 0x18a   :  { %v1436_v10 = vmul.f32 %v1803_v34, %v1244_v42  ;;  %vm1087_vm11 = vcmp.gt.f32.partialorder %v1023_v58, 0.0  ;;  %v1151_v29 = vsel %vm1055_vm10, %v2354_v63, 1.0  ;;  %v896_v50 = vmul.f32 %v2383_v26, %v2383_v26 }
 0x18b   :  { %v1119_v31 = vsel %vm1087_vm11, %v2356_v45, 1.0  ;;  %v1311_v4 = vsel %vm1087_vm11, %v1023_v58, 1.0  ;;  %v992_v28 = vmul.f32 %v2385_v62, %v2385_v62  ;;  %v1216_v3 = vmul.f32 %v2385_v62, %v2383_v26 }
 0x18c   :  { %v1468_v46 = vsub.f32 1.0, %v1436_v10  ;;  %v1183_v51 = vmul.f32 %v1151_v29, %v1119_v31  ;;  %v1343_v39 = vmul.f32 %v1311_v4, %v1279_v60  ;;  %v928_v38 = vadd.f32 %v896_v50, %v864_v23 }
 0x18d   :  { %v1024_v22 = vadd.f32 %v992_v28, %v960_v59  ;;  %v865_v63 = vmul.f32 %v2393_v11, %v2393_v11  ;;  %v961_v18 = vmul.f32 %v2395_v48, %v2395_v48  ;;  %v897_v45 = vmul.f32 %v2397_v37, %v2397_v37 }
 0x18e   :  { %v1805_v0 = vpop.eup %1804  ;;  %v1598_v47 = vadd.f32 %v1597_v7, %v1468_v46  ;;  %v1247_v1 = vadd.f32 %v1215_v8, %v1183_v51  ;;  %1808 = vrsqrt.f32 %v1343_v39  ;;  %vm1056_vm12 = vcmp.gt.f32.partialorder %v928_v38, 0.0 }
 0x18f   :  { %v1437_v26 = vmul.f32 %v1805_v0, %v1245_v20  ;;  %v1280_v62 = vsel %vm1056_vm12, %v928_v38, 1.0  ;;  %vm1088_vm13 = vcmp.gt.f32.partialorder %v1024_v22, 0.0  ;;  %v1152_v42 = vsel %vm1056_vm12, %v2379_v17, 1.0 }
 0x190   :  { %v1120_v21 = vsel %vm1088_vm13, %v2381_v2, 1.0  ;;  %v1312_v56 = vsel %vm1088_vm13, %v1024_v22, 1.0  ;;  %v929_v6 = vadd.f32 %v897_v45, %v865_v63  ;;  %v993_v49 = vmul.f32 %v2399_v44, %v2399_v44 }
 0x191   :  { %v1469_v15 = vsub.f32 1.0, %v1437_v26  ;;  %v1184_v24 = vmul.f32 %v1152_v42, %v1120_v21  ;;  %v1344_v55 = vmul.f32 %v1312_v56, %v1280_v62  ;;  %v1217_v54 = vmul.f32 %v2399_v44, %v2397_v37 }
 0x192   :  { %vm1057_vm14 = vcmp.gt.f32.partialorder %v929_v6, 0.0  ;;  %v1025_v41 = vadd.f32 %v993_v49, %v961_v18  ;;  %vm1614_vm0 = vcmask 0  }
 0x193   :  { %v1807_v9 = vpop.eup %1806  ;;  %v1248_v12 = vadd.f32 %v1216_v3, %v1184_v24  ;;  %1810 = vrsqrt.f32 %v1344_v55  ;;  %v1281_v30 = vsel %vm1057_vm14, %v929_v6, 1.0  ;;  %v1153_v17 = vsel %vm1057_vm14, %v2393_v11, 1.0 }
 0x194   :  { %v1438_v2 = vmul.f32 %v1807_v9, %v1246_v52  ;;  %vm1089_vm15 = vcmp.gt.f32.partialorder %v1025_v41, 0.0  ;;  %v1599_v53 = vadd.f32 %v1598_v47, %v1469_v15 }
 0x195   :  { %v1121_v14 = vsel %vm1089_vm15, %v2395_v48, 1.0  ;;  %v1313_v43 = vsel %vm1089_vm15, %v1025_v41, 1.0 }
 0x196   :  { %v1470_v61 = vsub.f32 1.0, %v1438_v2  ;;  %v1185_v35 = vmul.f32 %v1153_v17, %v1121_v14  ;;  %v1345_v32 = vmul.f32 %v1313_v43, %v1281_v30 }
 0x198   :  { %v1809_v20 = vpop.eup %1808  ;;  %v1249_v40 = vadd.f32 %v1217_v54, %v1185_v35  ;;  %1812 = vrsqrt.f32 %v1345_v32  ;;  %v1600_v37 = vadd.f32 %v1599_v53, %v1470_v61 }
 0x199   :  { %v1439_v44 = vmul.f32 %v1809_v20, %v1247_v1 }
 0x19b   :  { %v1471_v27 = vsub.f32 1.0, %v1439_v44 }
 0x19d   :  { %v1811_v36 = vpop.eup %1810  ;;  %v1601_v13 = vadd.f32 %v1600_v37, %v1471_v27 }
 0x19e   :  { %v1440_v25 = vmul.f32 %v1811_v36, %v1248_v12 }
 0x1a0   :  { %v1472_v19 = vsub.f32 1.0, %v1440_v25 }
 0x1a2   :  { %v1813_v11 = vpop.eup %1812  ;;  %v1602_v33 = vadd.f32 %v1601_v13, %v1472_v19 }
 0x1a3   :  { %v1441_v57 = vmul.f32 %v1813_v11, %v1249_v40 }
 0x1a5   :  { %v1473_v16 = vsub.f32 1.0, %v1441_v57 }
 0x1a7   :  { %v1603_v5 = vadd.f32 %v1602_v33, %v1473_v16 }
 0x1a9   :  { %1604 = vadd.xlane.f32.xlu0 %v1603_v5 }
 0x236   :  { %v1605_v48 = vpop.xlane.xlu0 %1604 }
 0x237   :  { %v1606_v8 = vrot.slane %v1605_v48, 4 }
 0x239   :  { %v1607_v58 = vadd.f32 %v1606_v8, %v1605_v48 }
 0x23b   :  { %v1608_v23 = vrot.slane %v1607_v58, 2 }
 0x23d   :  { %v1609_v59 = vadd.f32 %v1608_v23, %v1607_v58 }
 0x23f   :  { %v1610_v34 = vrot.slane %v1609_v59, 1 }
 0x241   :  { %v1611_v7 = vadd.f32 %v1610_v34, %v1609_v59 }
 0x243   :  { %1690 = vpush %v1611_v7 }
 0x274   :  { %s1691_s24 = spop %1690 }
 0x275   :  { %v1613_v52 = vstv %s1691_s24 }
 0x276   :  { %1615 = vst.msk [vmem:[#allocation3] sm:$0x1] %vm1614_vm0, %v1613_v52 }
 0x277   :  { %1825 = shalt.err (!%p1822_p4)
}
 0x278   :  { %s1826_s29 = scalar_lea.hbm %s2496_s3, 16 }
 0x279   :  { %p1827_p5 = scmp.ne.s32.totalorder %s2496_s3, %s1826_s29  ;;  %p1830_p6 = scmp.lt.u32.totalorder %s1826_s29, %s2496_s3 }
 0x27b   :  { %p1832_p7 = pnand %p1830_p6, %p1827_p5 }
 0x27d   :  { %1835 = shalt.err (!%p1832_p7)
}
 0x27e   :  { %1625 = dma.vmem_to_hbm [thread:$0]  %s1623_s1, 16, %s2496_s3, [#allocation4]  }
 0x27f   :  { %1836 = dma.done.wait [#allocation4], 16  }
 0x280   :  { %1837 = vsyncadd [#allocation4], 4294967280 }
 0x281   :  { %1629 = vsyncpa [#allocation4], 1 }

</bundles_post_ra>
